<compile_context>
chip_gen: v7x
topology: tpu7x:2x2x1
jax: 0.10.0
libtpu: 0.0.40
codegen_flags: <defaults>
</compile_context>

<pallas_src>
import math

import jax
import jax.numpy as jnp
from jax.experimental import pallas as pl
from jax.experimental.pallas import tpu as pltpu

LN_EPS = 1e-5


def _round_up(n, m):
    return pl.cdiv(n, m) * m


def _default_elementwise_dtype():
    # bf16 VALU/EUP paths exist on v6e/v7x; keep f32 elementwise on v5e & older.
    try:
        kind = jax.devices()[0].device_kind.lower()
    except Exception:
        return jnp.float32
    if ("v6" in kind) or ("v7" in kind) or ("7x" in kind):
        return jnp.bfloat16
    return jnp.float32


def mlp_block_kernel(x_ref, g_ref, beta_ref, w1_ref, b1_ref, w2_ref, b2_ref,
                     o_ref):
    # ---- LayerNorm over the embedding dim (f32, biased variance, one pass) ----
    x = x_ref[...].astype(jnp.float32)                           # (rt, E)
    mean = jnp.mean(x, axis=-1, keepdims=True)
    meansq = jnp.mean(x * x, axis=-1, keepdims=True)
    var = jnp.maximum(meansq - mean * mean, 0.0)                 # guard tiny negatives
    xn = (x - mean) * jax.lax.rsqrt(var + LN_EPS)
    xn = xn * g_ref[...] + beta_ref[...]

    # ---- Linear(E -> M): bf16 inputs, f32 accumulate on the MXU ----
    h = jnp.dot(xn.astype(w1_ref.dtype), w1_ref[...],
                preferred_element_type=jnp.float32)

    # Bias + GELU in the elementwise dtype carried by b1 (bf16 on v6e/v7x,
    # f32 on v5e).  tanh-approximate GELU -> EUP slot instead of VALU.
    h = h.astype(b1_ref.dtype) + b1_ref[...]
    h = jax.nn.gelu(h, approximate=True)

    # (Dropout: identity in eval mode.)

    # ---- Linear(M -> E): bf16 inputs, f32 accumulate ----
    y = jnp.dot(h.astype(w2_ref.dtype), w2_ref[...],
                preferred_element_type=jnp.float32)
    y = y + b2_ref[...]

    # (Dropout: identity in eval mode.)
    o_ref[...] = y.astype(o_ref.dtype)


def _make_call(rt, Np, E, M, out_dtype, vmem_limit, cost, single_buffer_consts):
    const_mode = {}
    if single_buffer_consts:
        # Constant-index blocks (weights/biases/LN affine) don't need a second
        # pipeline buffer -- halves their VMEM footprint (matters on v7x/64MiB).
        const_mode = dict(pipeline_mode=pl.Buffered(1))

    grid_spec = pltpu.PrefetchScalarGridSpec(
        num_scalar_prefetch=0,
        grid=(Np // rt,),
        in_specs=[
            pl.BlockSpec((rt, E), lambda i: (i, 0)),                  # x rows (pipelined)
            pl.BlockSpec((1, E), lambda i: (0, 0), **const_mode),     # LN gamma
            pl.BlockSpec((1, E), lambda i: (0, 0), **const_mode),     # LN beta
            pl.BlockSpec((E, M), lambda i: (0, 0), **const_mode),     # w1 (VMEM-resident)
            pl.BlockSpec((1, M), lambda i: (0, 0), **const_mode),     # b1
            pl.BlockSpec((M, E), lambda i: (0, 0), **const_mode),     # w2 (VMEM-resident)
            pl.BlockSpec((1, E), lambda i: (0, 0), **const_mode),     # b2
        ],
        out_specs=pl.BlockSpec((rt, E), lambda i: (i, 0)),
    )
    return pl.pallas_call(
        mlp_block_kernel,
        out_shape=jax.ShapeDtypeStruct((Np, E), out_dtype),
        grid_spec=grid_spec,
        compiler_params=pltpu.CompilerParams(
            dimension_semantics=("parallel",),
            vmem_limit_bytes=vmem_limit),
        cost_estimate=cost,
    )


def mlp_block(x, gamma, beta, w1, b1, w2, b2, *, row_tile=512,
              matmul_dtype=jnp.bfloat16, elementwise_dtype=None):
    """x: (B, S, E) float32.  Returns (B, S, E)."""
    B, S, E = x.shape
    M = w1.shape[1]
    N = B * S

    if elementwise_dtype is None:
        elementwise_dtype = _default_elementwise_dtype()

    # Large row tile to amortize the ~0.35us per-grid-step overhead, but keep
    # at least 2 grid steps when possible so v7x's two TensorCores both get work.
    rows8 = int(_round_up(N, 8))
    rt = int(min(row_tile, rows8))
    if rt == rows8 and rows8 >= 16:
        rt = int(_round_up(rows8 // 2, 8))
    Np = int(_round_up(N, rt))

    x2 = x.reshape(N, E)
    if Np != N:
        # Ragged tail: zero-pad rows, slice the result back afterwards.
        # (Zero rows go through LayerNorm safely: var + eps > 0.)
        x2 = jnp.pad(x2, ((0, Np - N), (0, 0)))

    gamma2 = gamma.reshape(1, E).astype(jnp.float32)
    beta2 = beta.reshape(1, E).astype(jnp.float32)
    b1_2 = b1.reshape(1, M).astype(elementwise_dtype)   # carries ew dtype into kernel
    b2_2 = b2.reshape(1, E).astype(jnp.float32)
    w1c = w1.astype(matmul_dtype)                        # halves weight DMA / VMEM
    w2c = w2.astype(matmul_dtype)

    wbytes = jnp.dtype(matmul_dtype).itemsize
    # VMEM need (counted generously: everything double-buffered, f32 intermediates),
    # then 2x headroom, clamped to [32 MiB, 56 MiB] (<= v7x physical 64 MiB).
    need = (2 * 2 * rt * E * 4
            + 2 * (E * M + M * E) * wbytes
            + 2 * (3 * E + M) * 4
            + 2 * rt * M * 4)
    vmem_limit = int(min(56 * 1024 * 1024, max(32 * 1024 * 1024, 2 * need)))

    cost = pl.CostEstimate(
        flops=4 * Np * E * M + 12 * Np * E,          # two matmuls + LN/elementwise
        transcendentals=Np * M,                      # tanh in approximate GELU
        bytes_accessed=(2 * Np * E + 3 * E + M) * 4 + 2 * E * M * wbytes,
    )

    args = (x2, gamma2, beta2, w1c, b1_2, w2c, b2_2)
    try:
        out = _make_call(rt, Np, E, M, x.dtype, vmem_limit, cost, True)(*args)
    except Exception:
        # pl.Buffered(1) hint rejected by this jax/Mosaic version -> default buffering.
        out = _make_call(rt, Np, E, M, x.dtype, vmem_limit, cost, False)(*args)
    return out[:N].reshape(B, S, E)


def reference(x, gamma, beta, w1, b1, w2, b2):
    # f32 reference matching the PyTorch module (exact-erf GELU, eval-mode dropout).
    mean = jnp.mean(x, axis=-1, keepdims=True)
    var = jnp.mean((x - mean) ** 2, axis=-1, keepdims=True)
    xn = (x - mean) / jnp.sqrt(var + LN_EPS) * gamma + beta
    h = xn @ w1 + b1
    h = 0.5 * h * (1.0 + jax.lax.erf(h / jnp.sqrt(2.0)))
    return h @ w2 + b2


if __name__ == "__main__":
    # Small but lane-dense shapes consistent with the module
    # (mlp_size = 4 * embedding_dim, both multiples of 128).
    B, S, E, M = 2, 16, 128, 512

    key = jax.random.PRNGKey(0)
    kx, kw1, kb1, kw2, kb2, kg, kbt = jax.random.split(key, 7)

    x = jax.random.normal(kx, (B, S, E), dtype=jnp.float32)

    # Non-trivial LN affine + PyTorch-style uniform linear init.
    gamma = 1.0 + 0.1 * jax.random.normal(kg, (E,), dtype=jnp.float32)
    beta = 0.1 * jax.random.normal(kbt, (E,), dtype=jnp.float32)
    lim1 = 1.0 / math.sqrt(E)
    w1 = jax.random.uniform(kw1, (E, M), jnp.float32, -lim1, lim1)
    b1 = jax.random.uniform(kb1, (M,), jnp.float32, -lim1, lim1)
    lim2 = 1.0 / math.sqrt(M)
    w2 = jax.random.uniform(kw2, (M, E), jnp.float32, -lim2, lim2)
    b2 = jax.random.uniform(kb2, (E,), jnp.float32, -lim2, lim2)

    out = jax.block_until_ready(mlp_block(x, gamma, beta, w1, b1, w2, b2))
    ref = reference(x, gamma, beta, w1, b1, w2, b2)
    assert out.shape == (B, S, E)
    # bf16 matmul inputs (f32 accumulate) + tanh-approx GELU -> small deviation
    # from the exact-erf f32 reference.
    assert jnp.allclose(out, ref, atol=3e-2, rtol=3e-2), \
        float(jnp.max(jnp.abs(out - ref)))

    # Exercise the ragged-row path: N = 2*5 = 10 rows (not a tile multiple).
    x_r = jax.random.normal(kx, (2, 5, E), dtype=jnp.float32)
    out_r = jax.block_until_ready(mlp_block(x_r, gamma, beta, w1, b1, w2, b2))
    ref_r = reference(x_r, gamma, beta, w1, b1, w2, b2)
    assert out_r.shape == (2, 5, E)
    assert jnp.allclose(out_r, ref_r, atol=3e-2, rtol=3e-2), \
        float(jnp.max(jnp.abs(out_r - ref_r)))

    print("KERNEL_OK")
</pallas_src>

<mosaic_0001>
module attributes {stable_mosaic.version = 11 : i64} {
  func.func @mlp_block_kernel(%arg0: i32, %arg1: memref<16x128xf32, #tpu.memory_space<vmem>>, %arg2: memref<1x128xf32, #tpu.memory_space<vmem>>, %arg3: memref<1x128xf32, #tpu.memory_space<vmem>>, %arg4: memref<128x512xbf16, #tpu.memory_space<vmem>>, %arg5: memref<1x512xf32, #tpu.memory_space<vmem>>, %arg6: memref<512x128xbf16, #tpu.memory_space<vmem>>, %arg7: memref<1x128xf32, #tpu.memory_space<vmem>>, %arg8: memref<16x128xf32, #tpu.memory_space<vmem>>) attributes {dimension_semantics = [#tpu.dimension_semantics<parallel>], iteration_bounds = array<i64: 2>, scalar_prefetch = 0 : i64, scratch_operands = 0 : i64, tpu.core_type = #tpu.core_type<tc>, window_params = [{transform_indices = @transform_0, window_bounds = array<i64: 16, 128>}, {pipeline_mode = #tpu.pipeline_mode<synchronous>, transform_indices = @transform_1, window_bounds = array<i64: 1, 128>}, {pipeline_mode = #tpu.pipeline_mode<synchronous>, transform_indices = @transform_2, window_bounds = array<i64: 1, 128>}, {pipeline_mode = #tpu.pipeline_mode<synchronous>, transform_indices = @transform_3, window_bounds = array<i64: 128, 512>}, {pipeline_mode = #tpu.pipeline_mode<synchronous>, transform_indices = @transform_4, window_bounds = array<i64: 1, 512>}, {pipeline_mode = #tpu.pipeline_mode<synchronous>, transform_indices = @transform_5, window_bounds = array<i64: 512, 128>}, {pipeline_mode = #tpu.pipeline_mode<synchronous>, transform_indices = @transform_6, window_bounds = array<i64: 1, 128>}, {transform_indices = @transform_7, window_bounds = array<i64: 16, 128>}]} {
    %c0 = arith.constant 0 : index
    %c0_0 = arith.constant 0 : index
    %0 = vector.load %arg1[%c0, %c0_0] : memref<16x128xf32, #tpu.memory_space<vmem>>, vector<16x128xf32>
    %cst = arith.constant dense<0.000000e+00> : vector<16xf32>
    %1 = vector.multi_reduction <add>, %0, %cst [1] : vector<16x128xf32> to vector<16xf32>
    %2 = vector.shape_cast %1 : vector<16xf32> to vector<16x1xf32>
    %cst_1 = arith.constant 1.280000e+02 : f32
    %3 = vector.broadcast %cst_1 : f32 to vector<16x1xf32>
    %4 = arith.divf %2, %3 : vector<16x1xf32>
    %5 = arith.mulf %0, %0 : vector<16x128xf32>
    %cst_2 = arith.constant dense<0.000000e+00> : vector<16xf32>
    %6 = vector.multi_reduction <add>, %5, %cst_2 [1] : vector<16x128xf32> to vector<16xf32>
    %7 = vector.shape_cast %6 : vector<16xf32> to vector<16x1xf32>
    %cst_3 = arith.constant 1.280000e+02 : f32
    %8 = vector.broadcast %cst_3 : f32 to vector<16x1xf32>
    %9 = arith.divf %7, %8 : vector<16x1xf32>
    %10 = arith.mulf %4, %4 : vector<16x1xf32>
    %11 = arith.subf %9, %10 : vector<16x1xf32>
    %cst_4 = arith.constant 0.000000e+00 : f32
    %12 = vector.broadcast %cst_4 : f32 to vector<16x1xf32>
    %13 = arith.maximumf %11, %12 : vector<16x1xf32>
    %14 = vector.broadcast %4 : vector<16x1xf32> to vector<16x128xf32>
    %15 = arith.subf %0, %14 : vector<16x128xf32>
    %cst_5 = arith.constant 9.99999974E-6 : f32
    %16 = vector.broadcast %cst_5 : f32 to vector<16x1xf32>
    %17 = arith.addf %13, %16 : vector<16x1xf32>
    %18 = math.rsqrt %17 : vector<16x1xf32>
    %19 = vector.broadcast %18 : vector<16x1xf32> to vector<16x128xf32>
    %20 = arith.mulf %15, %19 : vector<16x128xf32>
    %c0_6 = arith.constant 0 : index
    %c0_7 = arith.constant 0 : index
    %21 = vector.load %arg2[%c0_6, %c0_7] : memref<1x128xf32, #tpu.memory_space<vmem>>, vector<1x128xf32>
    %22 = vector.broadcast %21 : vector<1x128xf32> to vector<16x128xf32>
    %23 = arith.mulf %20, %22 : vector<16x128xf32>
    %c0_8 = arith.constant 0 : index
    %c0_9 = arith.constant 0 : index
    %24 = vector.load %arg3[%c0_8, %c0_9] : memref<1x128xf32, #tpu.memory_space<vmem>>, vector<1x128xf32>
    %25 = vector.broadcast %24 : vector<1x128xf32> to vector<16x128xf32>
    %26 = arith.addf %23, %25 : vector<16x128xf32>
    %27 = arith.truncf %26 : vector<16x128xf32> to vector<16x128xbf16>
    %c0_10 = arith.constant 0 : index
    %c0_11 = arith.constant 0 : index
    %28 = vector.load %arg4[%c0_10, %c0_11] : memref<128x512xbf16, #tpu.memory_space<vmem>>, vector<128x512xbf16>
    %cst_12 = arith.constant dense<0.000000e+00> : vector<16x512xf32>
    %29 = tpu.matmul %27, %28, %cst_12 {dimension_numbers = #tpu.dot_dimension_numbers<[1], [0], [0], [1], [0, 0, 1, 1], [], []>} : vector<16x128xbf16>, vector<128x512xbf16>, vector<16x512xf32> -> vector<16x512xf32>
    %c0_13 = arith.constant 0 : index
    %c0_14 = arith.constant 0 : index
    %30 = vector.load %arg5[%c0_13, %c0_14] : memref<1x512xf32, #tpu.memory_space<vmem>>, vector<1x512xf32>
    %31 = vector.broadcast %30 : vector<1x512xf32> to vector<16x512xf32>
    %32 = arith.addf %29, %31 : vector<16x512xf32>
    %33 = arith.mulf %32, %32 : vector<16x512xf32>
    %34 = arith.mulf %32, %33 : vector<16x512xf32>
    %cst_15 = arith.constant 4.471500e-02 : f32
    %35 = vector.broadcast %cst_15 : f32 to vector<16x512xf32>
    %36 = arith.mulf %35, %34 : vector<16x512xf32>
    %37 = arith.addf %32, %36 : vector<16x512xf32>
    %cst_16 = arith.constant 0.797884583 : f32
    %38 = vector.broadcast %cst_16 : f32 to vector<16x512xf32>
    %39 = arith.mulf %38, %37 : vector<16x512xf32>
    %40 = math.tanh %39 : vector<16x512xf32>
    %cst_17 = arith.constant 1.000000e+00 : f32
    %41 = vector.broadcast %cst_17 : f32 to vector<16x512xf32>
    %42 = arith.addf %41, %40 : vector<16x512xf32>
    %cst_18 = arith.constant 5.000000e-01 : f32
    %43 = vector.broadcast %cst_18 : f32 to vector<16x512xf32>
    %44 = arith.mulf %43, %42 : vector<16x512xf32>
    %45 = arith.mulf %32, %44 : vector<16x512xf32>
    %46 = arith.truncf %45 : vector<16x512xf32> to vector<16x512xbf16>
    %c0_19 = arith.constant 0 : index
    %c0_20 = arith.constant 0 : index
    %47 = vector.load %arg6[%c0_19, %c0_20] : memref<512x128xbf16, #tpu.memory_space<vmem>>, vector<512x128xbf16>
    %cst_21 = arith.constant dense<0.000000e+00> : vector<16x128xf32>
    %48 = tpu.matmul %46, %47, %cst_21 {dimension_numbers = #tpu.dot_dimension_numbers<[1], [0], [0], [1], [0, 0, 1, 1], [], []>} : vector<16x512xbf16>, vector<512x128xbf16>, vector<16x128xf32> -> vector<16x128xf32>
    %c0_22 = arith.constant 0 : index
    %c0_23 = arith.constant 0 : index
    %49 = vector.load %arg7[%c0_22, %c0_23] : memref<1x128xf32, #tpu.memory_space<vmem>>, vector<1x128xf32>
    %50 = vector.broadcast %49 : vector<1x128xf32> to vector<16x128xf32>
    %51 = arith.addf %48, %50 : vector<16x128xf32>
    %c0_24 = arith.constant 0 : index
    %c0_25 = arith.constant 0 : index
    %52 = vector.load %arg8[%c0_24, %c0_25] : memref<16x128xf32, #tpu.memory_space<vmem>>, vector<16x128xf32>
    tpu.vector_store %arg8[%c0_24, %c0_25], %51 {strides = array<i32>} : memref<16x128xf32, #tpu.memory_space<vmem>>, vector<16x128xf32>,
    return
  }
  func.func @transform_0(%arg0: i32) -> (i32, i32) {
    %c0_i32 = arith.constant 0 : i32
    %c0_i32_0 = arith.constant 0 : i32
    return %arg0, %c0_i32 : i32, i32
  }
  func.func @transform_1(%arg0: i32) -> (i32, i32) {
    %c0_i32 = arith.constant 0 : i32
    %c0_i32_0 = arith.constant 0 : i32
    %c0_i32_1 = arith.constant 0 : i32
    return %c0_i32, %c0_i32_0 : i32, i32
  }
  func.func @transform_2(%arg0: i32) -> (i32, i32) {
    %c0_i32 = arith.constant 0 : i32
    %c0_i32_0 = arith.constant 0 : i32
    %c0_i32_1 = arith.constant 0 : i32
    return %c0_i32, %c0_i32_0 : i32, i32
  }
  func.func @transform_3(%arg0: i32) -> (i32, i32) {
    %c0_i32 = arith.constant 0 : i32
    %c0_i32_0 = arith.constant 0 : i32
    %c0_i32_1 = arith.constant 0 : i32
    return %c0_i32, %c0_i32_0 : i32, i32
  }
  func.func @transform_4(%arg0: i32) -> (i32, i32) {
    %c0_i32 = arith.constant 0 : i32
    %c0_i32_0 = arith.constant 0 : i32
    %c0_i32_1 = arith.constant 0 : i32
    return %c0_i32, %c0_i32_0 : i32, i32
  }
  func.func @transform_5(%arg0: i32) -> (i32, i32) {
    %c0_i32 = arith.constant 0 : i32
    %c0_i32_0 = arith.constant 0 : i32
    %c0_i32_1 = arith.constant 0 : i32
    return %c0_i32, %c0_i32_0 : i32, i32
  }
  func.func @transform_6(%arg0: i32) -> (i32, i32) {
    %c0_i32 = arith.constant 0 : i32
    %c0_i32_0 = arith.constant 0 : i32
    %c0_i32_1 = arith.constant 0 : i32
    return %c0_i32, %c0_i32_0 : i32, i32
  }
  func.func @transform_7(%arg0: i32) -> (i32, i32) {
    %c0_i32 = arith.constant 0 : i32
    %c0_i32_0 = arith.constant 0 : i32
    return %arg0, %c0_i32 : i32, i32
  }
}

module attributes {stable_mosaic.version = 11 : i64} {
  func.func @mlp_block_kernel(%arg0: i32, %arg1: memref<16x128xf32, #tpu.memory_space<vmem>>, %arg2: memref<1x128xf32, #tpu.memory_space<vmem>>, %arg3: memref<1x128xf32, #tpu.memory_space<vmem>>, %arg4: memref<128x512xbf16, #tpu.memory_space<vmem>>, %arg5: memref<1x512xf32, #tpu.memory_space<vmem>>, %arg6: memref<512x128xbf16, #tpu.memory_space<vmem>>, %arg7: memref<1x128xf32, #tpu.memory_space<vmem>>, %arg8: memref<16x128xf32, #tpu.memory_space<vmem>>) attributes {dimension_semantics = [#tpu.dimension_semantics<parallel>], iteration_bounds = array<i64: 2>, scalar_prefetch = 0 : i64, scratch_operands = 0 : i64, tpu.core_type = #tpu.core_type<tc>, window_params = [{transform_indices = @transform_0, window_bounds = array<i64: 16, 128>}, {pipeline_mode = #tpu.pipeline_mode<synchronous>, transform_indices = @transform_1, window_bounds = array<i64: 1, 128>}, {pipeline_mode = #tpu.pipeline_mode<synchronous>, transform_indices = @transform_2, window_bounds = array<i64: 1, 128>}, {pipeline_mode = #tpu.pipeline_mode<synchronous>, transform_indices = @transform_3, window_bounds = array<i64: 128, 512>}, {pipeline_mode = #tpu.pipeline_mode<synchronous>, transform_indices = @transform_4, window_bounds = array<i64: 1, 512>}, {pipeline_mode = #tpu.pipeline_mode<synchronous>, transform_indices = @transform_5, window_bounds = array<i64: 512, 128>}, {pipeline_mode = #tpu.pipeline_mode<synchronous>, transform_indices = @transform_6, window_bounds = array<i64: 1, 128>}, {transform_indices = @transform_7, window_bounds = array<i64: 16, 128>}]} {
    %c0 = arith.constant 0 : index
    %c0_0 = arith.constant 0 : index
    %0 = vector.load %arg1[%c0, %c0_0] : memref<16x128xf32, #tpu.memory_space<vmem>>, vector<16x128xf32>
    %cst = arith.constant dense<0.000000e+00> : vector<16xf32>
    %1 = vector.multi_reduction <add>, %0, %cst [1] : vector<16x128xf32> to vector<16xf32>
    %2 = vector.shape_cast %1 : vector<16xf32> to vector<16x1xf32>
    %cst_1 = arith.constant 1.280000e+02 : f32
    %3 = vector.broadcast %cst_1 : f32 to vector<16x1xf32>
    %4 = arith.divf %2, %3 : vector<16x1xf32>
    %5 = arith.mulf %0, %0 : vector<16x128xf32>
    %cst_2 = arith.constant dense<0.000000e+00> : vector<16xf32>
    %6 = vector.multi_reduction <add>, %5, %cst_2 [1] : vector<16x128xf32> to vector<16xf32>
    %7 = vector.shape_cast %6 : vector<16xf32> to vector<16x1xf32>
    %cst_3 = arith.constant 1.280000e+02 : f32
    %8 = vector.broadcast %cst_3 : f32 to vector<16x1xf32>
    %9 = arith.divf %7, %8 : vector<16x1xf32>
    %10 = arith.mulf %4, %4 : vector<16x1xf32>
    %11 = arith.subf %9, %10 : vector<16x1xf32>
    %cst_4 = arith.constant 0.000000e+00 : f32
    %12 = vector.broadcast %cst_4 : f32 to vector<16x1xf32>
    %13 = arith.maximumf %11, %12 : vector<16x1xf32>
    %14 = vector.broadcast %4 : vector<16x1xf32> to vector<16x128xf32>
    %15 = arith.subf %0, %14 : vector<16x128xf32>
    %cst_5 = arith.constant 9.99999974E-6 : f32
    %16 = vector.broadcast %cst_5 : f32 to vector<16x1xf32>
    %17 = arith.addf %13, %16 : vector<16x1xf32>
    %18 = math.rsqrt %17 : vector<16x1xf32>
    %19 = vector.broadcast %18 : vector<16x1xf32> to vector<16x128xf32>
    %20 = arith.mulf %15, %19 : vector<16x128xf32>
    %c0_6 = arith.constant 0 : index
    %c0_7 = arith.constant 0 : index
    %21 = vector.load %arg2[%c0_6, %c0_7] : memref<1x128xf32, #tpu.memory_space<vmem>>, vector<1x128xf32>
    %22 = vector.broadcast %21 : vector<1x128xf32> to vector<16x128xf32>
    %23 = arith.mulf %20, %22 : vector<16x128xf32>
    %c0_8 = arith.constant 0 : index
    %c0_9 = arith.constant 0 : index
    %24 = vector.load %arg3[%c0_8, %c0_9] : memref<1x128xf32, #tpu.memory_space<vmem>>, vector<1x128xf32>
    %25 = vector.broadcast %24 : vector<1x128xf32> to vector<16x128xf32>
    %26 = arith.addf %23, %25 : vector<16x128xf32>
    %27 = arith.truncf %26 : vector<16x128xf32> to vector<16x128xbf16>
    %c0_10 = arith.constant 0 : index
    %c0_11 = arith.constant 0 : index
    %28 = vector.load %arg4[%c0_10, %c0_11] : memref<128x512xbf16, #tpu.memory_space<vmem>>, vector<128x512xbf16>
    %cst_12 = arith.constant dense<0.000000e+00> : vector<16x512xf32>
    %29 = tpu.matmul %27, %28, %cst_12 {dimension_numbers = #tpu.dot_dimension_numbers<[1], [0], [0], [1], [0, 0, 1, 1], [], []>} : vector<16x128xbf16>, vector<128x512xbf16>, vector<16x512xf32> -> vector<16x512xf32>
    %c0_13 = arith.constant 0 : index
    %c0_14 = arith.constant 0 : index
    %30 = vector.load %arg5[%c0_13, %c0_14] : memref<1x512xf32, #tpu.memory_space<vmem>>, vector<1x512xf32>
    %31 = vector.broadcast %30 : vector<1x512xf32> to vector<16x512xf32>
    %32 = arith.addf %29, %31 : vector<16x512xf32>
    %33 = arith.mulf %32, %32 : vector<16x512xf32>
    %34 = arith.mulf %32, %33 : vector<16x512xf32>
    %cst_15 = arith.constant 4.471500e-02 : f32
    %35 = vector.broadcast %cst_15 : f32 to vector<16x512xf32>
    %36 = arith.mulf %35, %34 : vector<16x512xf32>
    %37 = arith.addf %32, %36 : vector<16x512xf32>
    %cst_16 = arith.constant 0.797884583 : f32
    %38 = vector.broadcast %cst_16 : f32 to vector<16x512xf32>
    %39 = arith.mulf %38, %37 : vector<16x512xf32>
    %40 = math.tanh %39 : vector<16x512xf32>
    %cst_17 = arith.constant 1.000000e+00 : f32
    %41 = vector.broadcast %cst_17 : f32 to vector<16x512xf32>
    %42 = arith.addf %41, %40 : vector<16x512xf32>
    %cst_18 = arith.constant 5.000000e-01 : f32
    %43 = vector.broadcast %cst_18 : f32 to vector<16x512xf32>
    %44 = arith.mulf %43, %42 : vector<16x512xf32>
    %45 = arith.mulf %32, %44 : vector<16x512xf32>
    %46 = arith.truncf %45 : vector<16x512xf32> to vector<16x512xbf16>
    %c0_19 = arith.constant 0 : index
    %c0_20 = arith.constant 0 : index
    %47 = vector.load %arg6[%c0_19, %c0_20] : memref<512x128xbf16, #tpu.memory_space<vmem>>, vector<512x128xbf16>
    %cst_21 = arith.constant dense<0.000000e+00> : vector<16x128xf32>
    %48 = tpu.matmul %46, %47, %cst_21 {dimension_numbers = #tpu.dot_dimension_numbers<[1], [0], [0], [1], [0, 0, 1, 1], [], []>} : vector<16x512xbf16>, vector<512x128xbf16>, vector<16x128xf32> -> vector<16x128xf32>
    %c0_22 = arith.constant 0 : index
    %c0_23 = arith.constant 0 : index
    %49 = vector.load %arg7[%c0_22, %c0_23] : memref<1x128xf32, #tpu.memory_space<vmem>>, vector<1x128xf32>
    %50 = vector.broadcast %49 : vector<1x128xf32> to vector<16x128xf32>
    %51 = arith.addf %48, %50 : vector<16x128xf32>
    %c0_24 = arith.constant 0 : index
    %c0_25 = arith.constant 0 : index
    %52 = vector.load %arg8[%c0_24, %c0_25] : memref<16x128xf32, #tpu.memory_space<vmem>>, vector<16x128xf32>
    tpu.vector_store %arg8[%c0_24, %c0_25], %51 {strides = array<i32>} : memref<16x128xf32, #tpu.memory_space<vmem>>, vector<16x128xf32>,
    return
  }
  func.func @transform_0(%arg0: i32) -> (i32, i32) {
    %c0_i32 = arith.constant 0 : i32
    %c0_i32_0 = arith.constant 0 : i32
    return %arg0, %c0_i32 : i32, i32
  }
  func.func @transform_1(%arg0: i32) -> (i32, i32) {
    %c0_i32 = arith.constant 0 : i32
    %c0_i32_0 = arith.constant 0 : i32
    %c0_i32_1 = arith.constant 0 : i32
    return %c0_i32, %c0_i32_0 : i32, i32
  }
  func.func @transform_2(%arg0: i32) -> (i32, i32) {
    %c0_i32 = arith.constant 0 : i32
    %c0_i32_0 = arith.constant 0 : i32
    %c0_i32_1 = arith.constant 0 : i32
    return %c0_i32, %c0_i32_0 : i32, i32
  }
  func.func @transform_3(%arg0: i32) -> (i32, i32) {
    %c0_i32 = arith.constant 0 : i32
    %c0_i32_0 = arith.constant 0 : i32
    %c0_i32_1 = arith.constant 0 : i32
    return %c0_i32, %c0_i32_0 : i32, i32
  }
  func.func @transform_4(%arg0: i32) -> (i32, i32) {
    %c0_i32 = arith.constant 0 : i32
    %c0_i32_0 = arith.constant 0 : i32
    %c0_i32_1 = arith.constant 0 : i32
    return %c0_i32, %c0_i32_0 : i32, i32
  }
  func.func @transform_5(%arg0: i32) -> (i32, i32) {
    %c0_i32 = arith.constant 0 : i32
    %c0_i32_0 = arith.constant 0 : i32
    %c0_i32_1 = arith.constant 0 : i32
    return %c0_i32, %c0_i32_0 : i32, i32
  }
  func.func @transform_6(%arg0: i32) -> (i32, i32) {
    %c0_i32 = arith.constant 0 : i32
    %c0_i32_0 = arith.constant 0 : i32
    %c0_i32_1 = arith.constant 0 : i32
    return %c0_i32, %c0_i32_0 : i32, i32
  }
  func.func @transform_7(%arg0: i32) -> (i32, i32) {
    %c0_i32 = arith.constant 0 : i32
    %c0_i32_0 = arith.constant 0 : i32
    return %arg0, %c0_i32 : i32, i32
  }
}

</mosaic_0001>

<bundles_post_ra>
// kernel: tpu_custom_call.1
= control target key start
LH: loop header
LB: loop body
LE: loop exit
PB: predicated region body
PF: predicated region fallthrough
CT: control target
= control target key end

     0   :  { %12 = vsyncpa [#allocation3], 0  ;;  %s2044_s0 = inlined_call_operand.hbm [shape: f32[32,128], index: 0, kind: input, shape index: {}]   ;;  %s2045_s1 = inlined_call_operand.vmem [shape: f32[1,128], index: 1, kind: input, shape index: {}]   ;;  %s2046_s2 = inlined_call_operand.vmem [shape: f32[1,128], index: 2, kind: input, shape index: {}]   ;;  %s2047_s3 = inlined_call_operand.hbm [shape: bf16[128,512], index: 3, kind: input, shape index: {}]   ;;  %s2048_s4 = inlined_call_operand.vmem [shape: f32[1,512], index: 4, kind: input, shape index: {}]   ;;  %s2049_s5 = inlined_call_operand.hbm [shape: bf16[512,128], index: 5, kind: input, shape index: {}]   ;;  %s2050_s6 = inlined_call_operand.vmem [shape: f32[1,128], index: 6, kind: input, shape index: {}]   ;;  %s2051_s7 = inlined_call_operand.hbm [shape: f32[32,128], index: 7, kind: output, shape index: {}]  }
   0x1   :  { %14 = vsyncpa [#allocation3 + $0x1], 0 }
   0x2   :  { %15 = vsyncpa [#allocation6], 0 }
   0x3   :  { %16 = vsyncpa [#allocation4], 0 }
   0x4   :  { %18 = vsyncpa [#allocation4 + $0x1], 0  ;;  %s1726_s24 = smov 0   ;;  %s1728_s25 = smov 0  }
   0x5   :  { %s1730_s26 = smov 0   ;;  %s1732_s27 = smov 0  }
   0x6 LB: > { %s1747_s28 = sadd.s32 4294967295, %s1671_s27   ;;  %s1208_s29 = sadd.s32 4294967294, %s1671_s27   ;;  %s1671_s27 = sphi %s1732_s27, %s2071_s27   ;;  %s1667_s26 = sphi %s1730_s26, %s2070_s26   ;;  %s1663_s25 = sphi %s1728_s25, %s2069_s25   ;;  %s1659_s24 = sphi %s1726_s24, %s2068_s24  }
   0x7   : > { %p44_p0 = scmp.ne.s32.totalorder %s1663_s25, %s1659_s24  ;;  %p2052_p1 = scmp.eq.s32.totalorder %s1747_s28, 0 }
   0x8   : > { %p200_p3 = scmp.eq.s32.totalorder %s1208_s29, 1  ;;  %p1209_p5 = scmp.ge.s32.totalorder %s1671_s27, 1 }
   0x9   : > { %p1756_p4 = por %p2052_p1, %p44_p0  ;;  %p207_p7 = scmp.lt.s32.totalorder %s1671_s27, 3 }
   0xa   : > { %p1761_p6 = por %p200_p3, %p44_p0  ;;  %s1673_s10 = smov [#allocation5]  }
   0xb   : > { %s2055_s30 = scalar_select %p1756_p4, 1, 0 }
   0xc   : > { %s2056_s8 = scalar_select %p1761_p6, 1, 0 }
   0xd   : > { %p1766_p8 = pnand %p1209_p5, %p207_p7  ;;  %s225_s11 = sshll.u32 %s1673_s10, 4  ;;  %s1770_s11 = int_to_ptr.vmem [resolvable:$true] %s225_s11 }
   0xe   : > { %s1674_s13 = smov [#allocation7]   ;;  %s1515_s17 = scalar_lea.hbm %s2047_s3, 4096 }
   0xf   : > { %p1351_p9 = pneg %p1766_p8  ;;  %s241_s14 = sshll.u32 %s1674_s13, 4  ;;  %s1781_s14 = int_to_ptr.vmem [resolvable:$true] %s241_s14 }
  0x10   : > { %p1516_p12 = scmp.ne.s32.totalorder %s2047_s3, %s1515_s17  ;;  %p1522_p5 = scmp.lt.u32.totalorder %s1515_s17, %s2047_s3 }
  0x11   : > { %p1777_p11 = pnand %p1351_p9, %p2052_p1 }
  0x13   : > { %p1517_p13 = pneg %p1777_p11 }
  0x15   : > { %p1518_p0 = pnand %p1517_p13, %p1516_p12 }
  0x17   : > { %p1519_p3 = pneg %p1518_p0 }
  0x19   : > { %p1524_p7 = pnand %p1522_p5, %p1519_p3 }
  0x1b   : > { %1527 = shalt.err (!%p1524_p7)
}
  0x1c   : > { %s1528_s22 = scalar_lea.vmem %s1770_s11, 4096  ;;  %p1536_p2 = scmp.lt.s32.totalorder %s1770_s11, %s1770_s11 }
  0x1d   : > { %p1529_p9 = scmp.ne.s32.totalorder %s1770_s11, %s1528_s22  ;;  %p1537_p12 = scmp.lt.s32.totalorder %s1528_s22, %s1528_s22 }
  0x1f   : > { %p1531_p10 = pnand %p1529_p9, %p1517_p13  ;;  %p1538_p0 = por %p1537_p12, %p1536_p2 }
  0x21   : > { %p1532_p1 = pneg %p1531_p10 }
  0x23   : > { %p1539_p6 = pnand %p1538_p0, %p1532_p1 }
  0x25   : > { %1542 = shalt.err (!%p1539_p6)
}
  0x26   : > { %s1675_s23 = smov 256   ;;  %s1676_s29 = smov 16  }
  0x27   : > { %1354 = dma.hbm_to_vmem [thread:$0]  (!%p1777_p11), %s2047_s3, 4096, %s1770_s11, [#allocation6], %s1675_s23, %s1675_s23, %s1676_s29  }
  0x28   : > { %s1543_s17 = scalar_lea.hbm %s2049_s5, 4096 }
  0x29   : > { %p1544_p2 = scmp.ne.s32.totalorder %s2049_s5, %s1543_s17  ;;  %p1550_p10 = scmp.lt.u32.totalorder %s1543_s17, %s2049_s5 }
  0x2b   : > { %p1546_p1 = pnand %p1544_p2, %p1517_p13 }
  0x2d   : > { %p1547_p6 = pneg %p1546_p1 }
  0x2f   : > { %p1552_p3 = pnand %p1550_p10, %p1547_p6 }
  0x31   : > { %1555 = shalt.err (!%p1552_p3)
}
  0x32   : > { %s1556_s11 = scalar_lea.vmem %s1781_s14, 4096  ;;  %p1564_p12 = scmp.lt.s32.totalorder %s1781_s14, %s1781_s14 }
  0x33   : > { %p1557_p5 = scmp.ne.s32.totalorder %s1781_s14, %s1556_s11  ;;  %p1565_p0 = scmp.lt.s32.totalorder %s1556_s11, %s1556_s11 }
  0x35   : > { %p1559_p7 = pnand %p1557_p5, %p1517_p13  ;;  %p1566_p2 = por %p1565_p0, %p1564_p12 }
  0x37   : > { %p1560_p9 = pneg %p1559_p7 }
  0x39   : > { %p1567_p1 = pnand %p1566_p2, %p1560_p9 }
  0x3b   : > { %1570 = shalt.err (!%p1567_p1)
}
  0x3c   : > { %s1677_s22 = smov 64   ;;  %s1678_s23 = smov 4  }
  0x3d   : > { %1357 = dma.hbm_to_vmem [thread:$0]  (!%p1777_p11), %s2049_s5, 4096, %s1781_s14, [#allocation6], %s1677_s22, %s1677_s22, %s1678_s23  }
  0x3e   : > { %s1836_s13 = sadd.s32 1, %s1671_s27   ;;  %s31_s16 = sadd.s32 1, %s1667_s26 }
  0x3f   : > { %s28_s15 = ssub.s32 %s1671_s27, %s1836_s13  ;;  %p38_p6 = scmp.ne.s32.totalorder %s1667_s26, %s1663_s25 }
  0x40   : > { %p29_p13 = scmp.eq.s32.totalorder %s28_s15, 0  ;;  %p39_p10 = scmp.eq.s32.totalorder %s1671_s27, 0 }
  0x41   : > { %p2059_p5 = scmp.eq.s32.totalorder %s1747_s28, 1  ;;  %p1368_p9 = scmp.lt.s32.totalorder %s1671_s27, 2 }
  0x42   : > { %s1845_s17 = scalar_select %p29_p13, %s1667_s26, %s31_s16  }
  0x43   : > { %p40_p3 = por %p39_p10, %p38_p6  ;;  %p1849_p7 = por %p2059_p5, %p38_p6 }
  0x44   : > { %s258_s12 = sand.u32 1, %s1667_s26   ;;  %s1293_s14 = sshll.u32 %s1671_s27, 8 }
  0x45   : > { %s2060_s18 = scalar_select %p1849_p7, 1, 0 }
  0x46   : > { %s1213_s19 = sshll.u32 %s258_s12, 4  ;;  %s1859_s11 = scalar_lea.hbm %s2044_s0, %s1293_s14 }
  0x47   : > { %s262_s22 = scalar_lea.vmem [#allocation2], %s1213_s19  ;;  %p1863_p11 = pnand %p1368_p9, %p40_p3 }
  0x48   : > { %s269_s23 = sshll.u32 %s262_s22, 4  ;;  %s1867_s10 = scalar_lea.sflag [#allocation3], %s258_s12  ;;  %s1861_s23 = int_to_ptr.vmem [resolvable:$true] %s269_s23 }
  0x49   : > { %s1571_s15 = scalar_lea.hbm %s1859_s11, 256  ;;  %p1573_p0 = pneg %p1863_p11 }
  0x4a   : > { %p1572_p12 = scmp.ne.s32.totalorder %s1859_s11, %s1571_s15  ;;  %s1576_s14 = scalar_lea.hbm %s2044_s0, 512 }
  0x4b   : > { %p1577_p13 = scmp.lt.u32.totalorder %s1859_s11, %s2044_s0  ;;  %p1578_p6 = scmp.lt.u32.totalorder %s1576_s14, %s1571_s15 }
  0x4c   : > { %p1574_p2 = pnand %p1573_p0, %p1572_p12  ;;  %p1580_p3 = scmp.lt.u32.totalorder %s1571_s15, %s1859_s11 }
  0x4d   : > { %p1579_p10 = por %p1578_p6, %p1577_p13 }
  0x4e   : > { %p1575_p1 = pneg %p1574_p2 }
  0x4f   : > { %p1581_p5 = por %p1580_p3, %p1579_p10 }
  0x51   : > { %p1582_p9 = pnand %p1581_p5, %p1575_p1 }
  0x53   : > { %1585 = shalt.err (!%p1582_p9)
}
  0x54   : > { %s1586_s12 = scalar_lea.vmem %s1861_s23, 256  ;;  %s1679_s22 = smov [#allocation2]  }
  0x55   : > { %p1587_p12 = scmp.ne.s32.totalorder %s1861_s23, %s1586_s12  ;;  %s1591_s16 = sshll.u32 %s1679_s22, 4  ;;  %s1592_s16 = int_to_ptr.vmem [resolvable:$false] %s1591_s16 }
  0x56   : > { %s1593_s19 = scalar_lea.vmem %s1592_s16, 512  ;;  %p1594_p4 = scmp.lt.s32.totalorder %s1861_s23, %s1592_s16 }
  0x57   : > { %p1589_p2 = pnand %p1587_p12, %p1573_p0  ;;  %p1595_p13 = scmp.lt.s32.totalorder %s1593_s19, %s1586_s12 }
  0x59   : > { %p1590_p7 = pneg %p1589_p2  ;;  %p1596_p6 = por %p1595_p13, %p1594_p4 }
  0x5b   : > { %p1597_p10 = pnand %p1596_p6, %p1590_p7 }
  0x5d   : > { %1600 = shalt.err (!%p1597_p10)
}
  0x5e   : > { %s1680_s15 = smov 128   ;;  %s1681_s14 = smov 8  }
  0x5f   : > { %1361 = dma.hbm_to_vmem [thread:$0]  (!%p1863_p11), %s1859_s11, 256, %s1861_s23, %s1867_s10, %s1680_s15, %s1680_s15, %s1681_s14  }
  0x60   : > { %281 = sbr.rel (%p1766_p8) target bundleno = 769 (0x301), region = 48  ;;  %s1898_s20 = sand.u32 (!%p1766_p8), 1, %s1663_s25  }
  0x61   : > { %s1217_s21 = sshll.u32 (!%p1766_p8), %s1898_s20, 4  ;;  %s284_s12 = scalar_lea.sflag (!%p1766_p8), [#allocation3], %s1898_s20 }
  0x62   : > { %s287_s22 = scalar_lea.vmem (!%p1766_p8), [#allocation2], %s1217_s21  ;;  %p2062_p4 = scmp.ne.s32.totalorder (!%p1766_p8), %s2055_s30, 0 }
  0x67   : > { %1646 = dma.done.wait (%p2062_p4), %s284_s12, 256  }
  0x68   : > { %1648 = vsyncadd (%p2062_p4), %s284_s12, 4294967040  ;;  %p2063_p7 = scmp.eq.s32.totalorder %s1747_s28, 0 }
  0x6a   : > { %1650 = dma.done.wait (%p2063_p7), [#allocation6], 8192   ;;  %p2064_p8 = pmov %p2063_p7 }
  0x6b   : > { %v1912_v0 = vld [vmem:[%s287_s22] sm:$0xff]  ;;  %v1914_v1 = vld [vmem:[%s287_s22 + $0x8] sm:$0xff]  ;;  %v1682_v32 = vmov 0   ;;  %s325_s15 = scalar_lea.vmem [#allocation8], %s1217_s21  ;;  %s1294_s12 = sshll.u32 %s1747_s28, 8 }
  0x6c   : > { %1652 = vsyncadd (%p2064_p8), [#allocation6], 4294959104  ;;  %331 = vadd.xlane.f32.xlu0 %v1912_v0  ;;  %v338_v2 = vmul.f32 %v1912_v0, %v1912_v0  ;;  %v339_v3 = vmul.f32 %v1914_v1, %v1914_v1  ;;  %v1415_v4 = vld [vmem:[#allocation5 + $0x4] ss:$16 sps:$4 sm:$0xff]   ;;  %v1417_v5 = vld [vmem:[#allocation5 + $0xc] ss:$16 sps:$4 sm:$0xff]   ;;  %625 = vmatprep.mubr.bf16.mxu0 %v1682_v32  ;;  %s2000_s21 = scalar_lea.hbm %s2051_s7, %s1294_s12 }
  0x6d   : > { %v1419_v6 = vld [vmem:[#allocation5] ss:$16 sps:$4 sm:$0xff]   ;;  %v1420_v7 = vld [vmem:[#allocation5 + $0x8] ss:$16 sps:$4 sm:$0xff]   ;;  %593 = vmatprep.subr.bf16.mxu0 %v1415_v4  ;;  %636 = vmatprep.subr.bf16.mxu1 %v1417_v5  ;;  %v1421_v8 = vld [vmem:[#allocation5 + $0x24] ss:$16 sps:$4 sm:$0xff]  }
  0x6e   : > { %340 = vadd.xlane.f32.xlu1 %v338_v2  ;;  %594 = vmatpush1.bf16.msra.mxu0 %v1419_v6  ;;  %v1423_v9 = vld [vmem:[#allocation5 + $0x2c] ss:$16 sps:$4 sm:$0xff]   ;;  %v1425_v10 = vld [vmem:[#allocation5 + $0x20] ss:$16 sps:$4 sm:$0xff]   ;;  %v1426_v11 = vld [vmem:[#allocation5 + $0x28] ss:$16 sps:$4 sm:$0xff]  }
  0x6f   : > { %637 = vmatpush1.bf16.msra.mxu1 %v1420_v7  ;;  %595 = vmatprep.subr.bf16.mxu0 %v1421_v8  ;;  %v1427_v12 = vld [vmem:[#allocation5 + $0x44] ss:$16 sps:$4 sm:$0xff]   ;;  %v1429_v13 = vld [vmem:[#allocation5 + $0x4c] ss:$16 sps:$4 sm:$0xff]   ;;  %v1431_v14 = vld [vmem:[#allocation5 + $0x40] ss:$16 sps:$4 sm:$0xff]  }
  0x70   : > { %333 = vadd.xlane.f32.xlu0 %v1914_v1  ;;  %638 = vmatprep.subr.bf16.mxu1 %v1423_v9  ;;  %v1432_v15 = vld [vmem:[#allocation5 + $0x48] ss:$16 sps:$4 sm:$0xff]   ;;  %v1433_v16 = vld [vmem:[#allocation5 + $0x64] ss:$16 sps:$4 sm:$0xff]   ;;  %v1435_v17 = vld [vmem:[#allocation5 + $0x6c] ss:$16 sps:$4 sm:$0xff]  }
  0x71   : > { %v1437_v18 = vld [vmem:[#allocation5 + $0x60] ss:$16 sps:$4 sm:$0xff]   ;;  %v1438_v19 = vld [vmem:[#allocation5 + $0x68] ss:$16 sps:$4 sm:$0xff]   ;;  %v1439_v20 = vld [vmem:[#allocation5 + $0x84] ss:$16 sps:$4 sm:$0xff]   ;;  %668 = vmatprep.mubr.bf16.mxu1 %v1682_v32 }
  0x72   : > { %342 = vadd.xlane.f32.xlu1 %v339_v3  ;;  %596 = vmatpush1.bf16.msra.mxu0 %v1425_v10  ;;  %v1441_v21 = vld [vmem:[#allocation5 + $0x8c] ss:$16 sps:$4 sm:$0xff]   ;;  %v1443_v22 = vld [vmem:[#allocation5 + $0x80] ss:$16 sps:$4 sm:$0xff]   ;;  %v1444_v23 = vld [vmem:[#allocation5 + $0x88] ss:$16 sps:$4 sm:$0xff]  }
  0x73   : > { %639 = vmatpush1.bf16.msra.mxu1 %v1426_v11  ;;  %597 = vmatprep.subr.bf16.mxu0 %v1427_v12  ;;  %v1445_v24 = vld [vmem:[#allocation5 + $0xa4] ss:$16 sps:$4 sm:$0xff]   ;;  %v1447_v25 = vld [vmem:[#allocation5 + $0xac] ss:$16 sps:$4 sm:$0xff]   ;;  %v1449_v26 = vld [vmem:[#allocation5 + $0xa0] ss:$16 sps:$4 sm:$0xff]  }
  0x74   : > { %640 = vmatprep.subr.bf16.mxu1 %v1429_v13  ;;  %v1450_v27 = vld [vmem:[#allocation5 + $0xa8] ss:$16 sps:$4 sm:$0xff]   ;;  %v1451_v28 = vld [vmem:[#allocation5 + $0xc4] ss:$16 sps:$4 sm:$0xff]   ;;  %v1453_v29 = vld [vmem:[#allocation5 + $0xcc] ss:$16 sps:$4 sm:$0xff]  }
  0x75   : > { %v1455_v30 = vld [vmem:[#allocation5 + $0xc0] ss:$16 sps:$4 sm:$0xff]   ;;  %v1456_v31 = vld [vmem:[#allocation5 + $0xc8] ss:$16 sps:$4 sm:$0xff]   ;;  %v1457_v33 = vld [vmem:[#allocation5 + $0xe4] ss:$16 sps:$4 sm:$0xff]  }
  0x76   : > { %598 = vmatpush1.bf16.msra.mxu0 %v1431_v14  ;;  %v1459_v34 = vld [vmem:[#allocation5 + $0xec] ss:$16 sps:$4 sm:$0xff]   ;;  %v1461_v35 = vld [vmem:[#allocation5 + $0xe0] ss:$16 sps:$4 sm:$0xff]   ;;  %v1462_v36 = vld [vmem:[#allocation5 + $0xe8] ss:$16 sps:$4 sm:$0xff]  }
  0x77   : > { %641 = vmatpush1.bf16.msra.mxu1 %v1432_v15  ;;  %599 = vmatprep.subr.bf16.mxu0 %v1433_v16  ;;  %v1221_v56 = vld [vmem:[%s2045_s1] ss:$0 sm:$0xff]  ;;  %v1468_v7 = vld [vmem:[#allocation7 + $0xc8] sm:$0xff]   ;;  %v1471_v10 = vld [vmem:[#allocation7 + $0x50] sm:$0xff]   ;;  %s1116_s14 = sshll.u32 %s325_s15, 4  ;;  %s1103_s9 = scalar_lea.sflag [#allocation4], %s1898_s20  ;;  %s1995_s14 = int_to_ptr.vmem [resolvable:$true] %s1116_s14 }
  0x78   : > { %642 = vmatprep.subr.bf16.mxu1 %v1435_v17  ;;  %v1222_v61 = vld [vmem:[%s2046_s2] ss:$0 sm:$0xff]  ;;  %v1469_v8 = vld [vmem:[#allocation7 + $0x8] sm:$0xff]   ;;  %v1472_v11 = vld [vmem:[#allocation7 + $0xd0] sm:$0xff]   ;;  %s1601_s11 = scalar_lea.vmem %s1995_s14, 256  ;;  %p2065_p0 = scmp.ne.s32.totalorder %s2060_s18, 0 }
  0x79   : > { %v1464_v4 = vld [vmem:[#allocation7 + $0xc0] sm:$0xff]   ;;  %v1470_v9 = vld [vmem:[#allocation7 + $0x88] sm:$0xff]   ;;  %v1473_v12 = vld [vmem:[#allocation7 + $0x10] sm:$0xff]   ;;  %p1602_p11 = scmp.ne.s32.totalorder %s1995_s14, %s1601_s11  ;;  %s1683_s28 = smov [#allocation8]  }
  0x7a   : > { %600 = vmatpush1.bf16.msra.mxu0 %v1437_v18  ;;  %v1465_v5 = vld [vmem:[#allocation7] sm:$0xff]   ;;  %v1474_v13 = vld [vmem:[#allocation7 + $0x90] sm:$0xff]   ;;  %v1475_v14 = vld [vmem:[#allocation7 + $0x58] sm:$0xff]   ;;  %s1605_s23 = sshll.u32 %s1683_s28, 4  ;;  %s1606_s23 = int_to_ptr.vmem [resolvable:$false] %s1605_s23 }
  0x7b   : > { %643 = vmatpush1.bf16.msra.mxu1 %v1438_v19  ;;  %601 = vmatprep.subr.bf16.mxu0 %v1439_v20  ;;  %v1466_v6 = vld [vmem:[#allocation7 + $0x80] sm:$0xff]   ;;  %v1476_v15 = vld [vmem:[#allocation7 + $0xd8] sm:$0xff]   ;;  %p1603_p1 = pnand %p1602_p11, %p2065_p0  ;;  %s1607_s29 = scalar_lea.vmem %s1606_s23, 512 }
  0x7c   : > { %644 = vmatprep.subr.bf16.mxu1 %v1441_v21  ;;  %v1477_v16 = vld [vmem:[#allocation7 + $0x18] sm:$0xff]   ;;  %v1479_v18 = vld [vmem:[#allocation7 + $0x60] sm:$0xff]   ;;  %p1608_p5 = scmp.lt.s32.totalorder %s1995_s14, %s1606_s23  ;;  %p1609_p9 = scmp.lt.s32.totalorder %s1607_s29, %s1601_s11 }
  0x7d   : > { %v1478_v17 = vld [vmem:[#allocation7 + $0x98] sm:$0xff]   ;;  %v1480_v19 = vld [vmem:[#allocation7 + $0xe0] sm:$0xff]   ;;  %p1604_p3 = pneg %p1603_p1 }
  0x7e   : > { %602 = vmatpush1.bf16.msra.mxu0 %v1443_v22  ;;  %v1481_v20 = vld [vmem:[#allocation7 + $0x20] sm:$0xff]   ;;  %v1483_v22 = vld [vmem:[#allocation7 + $0x68] sm:$0xff]   ;;  %v1493_v32 = vld [vmem:[#allocation7 + $0x38] sm:$0xff]   ;;  %p1610_p12 = por %p1609_p9, %p1608_p5 }
  0x7f   : > { %645 = vmatpush1.bf16.msra.mxu1 %v1444_v23  ;;  %603 = vmatprep.subr.bf16.mxu0 %v1445_v24  ;;  %v1482_v21 = vld [vmem:[#allocation7 + $0xa0] sm:$0xff]   ;;  %v1484_v23 = vld [vmem:[#allocation7 + $0xe8] sm:$0xff]  }
  0x80   : > { %646 = vmatprep.subr.bf16.mxu1 %v1447_v25  ;;  %v1485_v24 = vld [vmem:[#allocation7 + $0x28] sm:$0xff]   ;;  %p1611_p2 = pnand %p1610_p12, %p1604_p3 }
  0x81   : > { %v1486_v25 = vld [vmem:[#allocation7 + $0xa8] sm:$0xff]  }
  0x82   : > { %604 = vmatpush1.bf16.msra.mxu0 %v1449_v26  ;;  %v1487_v26 = vld [vmem:[#allocation7 + $0x70] sm:$0xff]  }
  0x83   : > { %647 = vmatpush1.bf16.msra.mxu1 %v1450_v27  ;;  %605 = vmatprep.subr.bf16.mxu0 %v1451_v28  ;;  %v1488_v27 = vld [vmem:[#allocation7 + $0xf0] sm:$0xff]  }
  0x84   : > { %648 = vmatprep.subr.bf16.mxu1 %v1453_v29  ;;  %v1489_v28 = vld [vmem:[#allocation7 + $0x30] sm:$0xff]  }
  0x85   : > { %v1490_v29 = vld [vmem:[#allocation7 + $0xb0] sm:$0xff]  }
  0x86   : > { %606 = vmatpush1.bf16.msra.mxu0 %v1455_v30  ;;  %v1491_v30 = vld [vmem:[#allocation7 + $0x78] sm:$0xff]  }
  0x87   : > { %649 = vmatpush1.bf16.msra.mxu1 %v1456_v31  ;;  %607 = vmatprep.subr.bf16.mxu0 %v1457_v33  ;;  %v1492_v31 = vld [vmem:[#allocation7 + $0xf8] sm:$0xff]  }
  0x88   : > { %650 = vmatprep.subr.bf16.mxu1 %v1459_v34  ;;  %v1494_v33 = vld [vmem:[#allocation7 + $0xb8] sm:$0xff]   ;;  %v413_v34 = vlaneseq }
  0x8a   : > { %608 = vmatpush1.bf16.msra.mxu0 %v1461_v35  ;;  %v414_v35 = vshrl.u32 %v413_v34, 7 }
  0x8b   : > { %651 = vmatpush1.bf16.msra.mxu1 %v1462_v36 }
  0x8c   : > { %1317 = vmatprep.subr.bf16.mxu1 %v1464_v4  ;;  %v415_v36 = vsub.s32 0, %v414_v35 }
  0xf9   : > { %v332_v37 = vpop.xlane.xlu0 %331 }
  0xfa   : > { %v336_v38 = vmul.f32 0.0078125, %v332_v37  ;;  %v423_v37 = vsub.s32 2, %v414_v35 }
  0xfb   : > { %v341_v39 = vpop.xlane.xlu1 %340 }
  0xfc   : > { %v346_v40 = vmul.f32 %v336_v38, %v336_v38  ;;  %v344_v41 = vmul.f32 0.0078125, %v341_v39  ;;  %v352_v53 = vsub.f32 %v1912_v0, %v336_v38  ;;  %v1463_v0 = vld [vmem:[#allocation7 + $0x40] sm:$0xff]   ;;  %v419_v39 = vsub.s32 1, %v414_v35 }
  0xfd   : > { %v334_v42 = vpop.xlane.xlu0 %333  ;;  %1295 = vmatprep.subr.bf16.mxu0 %v1463_v0  ;;  %v411_v38 = vld [vmem:[%s2048_s4] sm:$0xf] }
  0xfe   : > { %v348_v43 = vsub.f32 %v344_v41, %v346_v40  ;;  %v337_v44 = vmul.f32 0.0078125, %v334_v42  ;;  %v427_v40 = vsub.s32 3, %v414_v35  ;;  %v416_v41 = vrot.slane %v411_v38, %v415_v36 }
  0xff   : > { %v343_v45 = vpop.xlane.xlu1 %342  ;;  %v424_v42 = vrot.slane %v411_v38, %v423_v37 }
 0x100   : > { %v350_v46 = vmax.f32 %v348_v43, 0.0  ;;  %v347_v47 = vmul.f32 %v337_v44, %v337_v44  ;;  %v345_v48 = vmul.f32 0.0078125, %v343_v45  ;;  %v353_v57 = vsub.f32 %v1914_v1, %v337_v44  ;;  %v1467_v1 = vld [vmem:[#allocation7 + $0x48] sm:$0xff]  }
 0x101   : > { %v420_v43 = vrot.slane %v411_v38, %v419_v39  ;;  %v428_v44 = vrot.slane %v411_v38, %v427_v40 }
 0x102   : > { %v354_v49 = vadd.f32 1e-05, %v350_v46  ;;  %v349_v50 = vsub.f32 %v345_v48, %v347_v47 }
 0x104   : > { %1495 = vrsqrt.f32 %v354_v49  ;;  %v351_v51 = vmax.f32 %v349_v50, 0.0 }
 0x106   : > { %v355_v52 = vadd.f32 1e-05, %v351_v51 }
 0x108   : > { %1497 = vrsqrt.f32 %v355_v52 }
 0x10e   : > { %v1496_v54 = vpop.eup %1495 }
 0x10f   : > { %v358_v55 = vmul.f32 %v1496_v54, %v352_v53 }
 0x111   : > { %v367_v60 = vmul.f32 %v1221_v56, %v358_v55 }
 0x112   : > { %v1498_v58 = vpop.eup %1497 }
 0x113   : > { %v359_v59 = vmul.f32 %v1498_v58, %v353_v57  ;;  %v376_v63 = vadd.f32 %v1222_v61, %v367_v60 }
 0x115   : > { %v368_v62 = vmul.f32 %v1221_v56, %v359_v59 }
 0x117   : > { %v377_v2 = vadd.f32 %v1222_v61, %v368_v62 }
 0x119   : > { %v378_v3 = vpack.c.bf16 %v377_v2, %v376_v63 }
 0x11b   : > { %626 = vmatmul.mubr.bf16.vlgmr.msra.gmra.mrb[0].mxu0 %v378_v3  ;;  %669 = vmatmul.mubr.bf16.vlgmr.msra.gmra.mrb[0].mxu1 %v378_v3 }
 0x11c   : > { %1296 = vmatpush3.bf16.msra.mxu0 %v1465_v5  ;;  %1318 = vmatpush3.bf16.msra.mxu1 %v1466_v6 }
 0x11d   : > { %1297 = vmatprep.subr.bf16.mxu0 %v1467_v1  ;;  %1319 = vmatprep.subr.bf16.mxu1 %v1468_v7 }
 0x120   : > { %1298 = vmatpush3.bf16.msra.mxu0 %v1469_v8  ;;  %1320 = vmatpush3.bf16.msra.mxu1 %v1470_v9 }
 0x121   : > { %1299 = vmatprep.subr.bf16.mxu0 %v1471_v10  ;;  %1321 = vmatprep.subr.bf16.mxu1 %v1472_v11 }
 0x124   : > { %1300 = vmatpush3.bf16.msra.mxu0 %v1473_v12  ;;  %1322 = vmatpush3.bf16.msra.mxu1 %v1474_v13 }
 0x125   : > { %1301 = vmatprep.subr.bf16.mxu0 %v1475_v14  ;;  %1323 = vmatprep.subr.bf16.mxu1 %v1476_v15 }
 0x128   : > { %1302 = vmatpush3.bf16.msra.mxu0 %v1477_v16  ;;  %1324 = vmatpush3.bf16.msra.mxu1 %v1478_v17 }
 0x129   : > { %1303 = vmatprep.subr.bf16.mxu0 %v1479_v18  ;;  %1325 = vmatprep.subr.bf16.mxu1 %v1480_v19 }
 0x12c   : > { %1304 = vmatpush3.bf16.msra.mxu0 %v1481_v20  ;;  %1326 = vmatpush3.bf16.msra.mxu1 %v1482_v21 }
 0x12d   : > { %1305 = vmatprep.subr.bf16.mxu0 %v1483_v22  ;;  %1327 = vmatprep.subr.bf16.mxu1 %v1484_v23 }
 0x130   : > { %1306 = vmatpush3.bf16.msra.mxu0 %v1485_v24  ;;  %1328 = vmatpush3.bf16.msra.mxu1 %v1486_v25 }
 0x131   : > { %1307 = vmatprep.subr.bf16.mxu0 %v1487_v26  ;;  %1329 = vmatprep.subr.bf16.mxu1 %v1488_v27 }
 0x134   : > { %1308 = vmatpush3.bf16.msra.mxu0 %v1489_v28  ;;  %1330 = vmatpush3.bf16.msra.mxu1 %v1490_v29 }
 0x135   : > { %1309 = vmatprep.subr.bf16.mxu0 %v1491_v30  ;;  %1331 = vmatprep.subr.bf16.mxu1 %v1492_v31 }
 0x138   : > { %1310 = vmatpush3.bf16.msra.mxu0 %v1493_v32  ;;  %1332 = vmatpush3.bf16.msra.mxu1 %v1494_v33 }
 0x1ee   : > { %v627_v45 = vpop.f32.mrb[0].mxu0  ;;  %v670_v46 = vpop.f32.mrb[0].mxu1 }
 0x1ef   : > { %v1933_v47 = vadd.f32 %v627_v45, %v416_v41  ;;  %v1935_v48 = vadd.f32 %v670_v46, %v424_v42  ;;  %v629_v49 = vpop.f32.mrb[1].mxu0  ;;  %v672_v50 = vpop.f32.mrb[1].mxu1 }
 0x1f0   : > { %v1937_v51 = vadd.f32 %v629_v49, %v420_v43  ;;  %v1939_v52 = vadd.f32 %v672_v50, %v428_v44  ;;  %v631_v53 = vpop.f32.mrb[2].mxu0  ;;  %v674_v54 = vpop.f32.mrb[2].mxu1 }
 0x1f1   : > { %v679_v55 = vmul.f32 %v1933_v47, %v1933_v47  ;;  %v681_v56 = vmul.f32 %v1935_v48, %v1935_v48  ;;  %v1945_v57 = vadd.f32 %v631_v53, %v416_v41  ;;  %v1947_v58 = vadd.f32 %v674_v54, %v424_v42  ;;  %v633_v59 = vpop.f32.mrb[3].mxu0  ;;  %v676_v60 = vpop.f32.mrb[3].mxu1 }
 0x1f2   : > { %v680_v61 = vmul.f32 %v1937_v51, %v1937_v51  ;;  %v682_v62 = vmul.f32 %v1939_v52, %v1939_v52  ;;  %v1953_v63 = vadd.f32 %v633_v59, %v420_v43  ;;  %v1955_v2 = vadd.f32 %v676_v60, %v428_v44 }
 0x1f3   : > { %v687_v3 = vmul.f32 %v679_v55, %v1933_v47  ;;  %v689_v0 = vmul.f32 %v681_v56, %v1935_v48  ;;  %v683_v4 = vmul.f32 %v1945_v57, %v1945_v57  ;;  %v685_v5 = vmul.f32 %v1947_v58, %v1947_v58 }
 0x1f4   : > { %v688_v6 = vmul.f32 %v680_v61, %v1937_v51  ;;  %v690_v1 = vmul.f32 %v682_v62, %v1939_v52  ;;  %v684_v7 = vmul.f32 %v1953_v63, %v1953_v63  ;;  %v686_v8 = vmul.f32 %v1955_v2, %v1955_v2 }
 0x1f5   : > { %v695_v9 = vmul.f32 0.044715, %v687_v3  ;;  %v697_v10 = vmul.f32 0.044715, %v689_v0  ;;  %v691_v11 = vmul.f32 %v683_v4, %v1945_v57  ;;  %v693_v12 = vmul.f32 %v685_v5, %v1947_v58 }
 0x1f6   : > { %v696_v13 = vmul.f32 0.044715, %v688_v6  ;;  %v698_v14 = vmul.f32 0.044715, %v690_v1  ;;  %v692_v15 = vmul.f32 %v684_v7, %v1953_v63  ;;  %v694_v16 = vmul.f32 %v686_v8, %v1955_v2 }
 0x1f7   : > { %v703_v17 = vadd.f32 %v695_v9, %v1933_v47  ;;  %v705_v18 = vadd.f32 %v697_v10, %v1935_v48  ;;  %v699_v19 = vmul.f32 0.044715, %v691_v11  ;;  %v701_v20 = vmul.f32 0.044715, %v693_v12 }
 0x1f8   : > { %v704_v21 = vadd.f32 %v696_v13, %v1937_v51  ;;  %v706_v22 = vadd.f32 %v698_v14, %v1939_v52  ;;  %v700_v23 = vmul.f32 0.044715, %v692_v15  ;;  %v702_v24 = vmul.f32 0.044715, %v694_v16 }
 0x1f9   : > { %v711_v25 = vmul.f32 0.7978846, %v703_v17  ;;  %v713_v26 = vmul.f32 0.7978846, %v705_v18  ;;  %v707_v27 = vadd.f32 %v699_v19, %v1945_v57  ;;  %v709_v28 = vadd.f32 %v701_v20, %v1947_v58 }
 0x1fa   : > { %v712_v29 = vmul.f32 0.7978846, %v704_v21  ;;  %v714_v30 = vmul.f32 0.7978846, %v706_v22  ;;  %v708_v31 = vadd.f32 %v700_v23, %v1953_v63  ;;  %v710_v32 = vadd.f32 %v702_v24, %v1955_v2 }
 0x1fb   : > { %1499 = vtanh.f32 %v711_v25  ;;  %v715_v33 = vmul.f32 0.7978846, %v707_v27  ;;  %v717_v34 = vmul.f32 0.7978846, %v709_v28 }
 0x1fc   : > { %1501 = vtanh.f32 %v713_v26  ;;  %v716_v35 = vmul.f32 0.7978846, %v708_v31  ;;  %v718_v36 = vmul.f32 0.7978846, %v710_v32 }
 0x1fd   : > { %1503 = vtanh.f32 %v712_v29 }
 0x1fe   : > { %1505 = vtanh.f32 %v714_v30 }
 0x1ff   : > { %1507 = vtanh.f32 %v715_v33 }
 0x200   : > { %1509 = vtanh.f32 %v717_v34 }
 0x201   : > { %1511 = vtanh.f32 %v716_v35 }
 0x202   : > { %1513 = vtanh.f32 %v718_v36 }
 0x205   : > { %v1500_v37 = vpop.eup %1499 }
 0x206   : > { %v1502_v38 = vpop.eup %1501  ;;  %v727_v39 = vadd.f32 1.0, %v1500_v37 }
 0x207   : > { %v1504_v40 = vpop.eup %1503  ;;  %v729_v41 = vadd.f32 1.0, %v1502_v38 }
 0x208   : > { %v1506_v42 = vpop.eup %1505  ;;  %v728_v43 = vadd.f32 1.0, %v1504_v40  ;;  %v735_v49 = vmul.f32 0.5, %v727_v39 }
 0x209   : > { %v1508_v44 = vpop.eup %1507  ;;  %v730_v45 = vadd.f32 1.0, %v1506_v42  ;;  %v737_v54 = vmul.f32 0.5, %v729_v41 }
 0x20a   : > { %v1510_v46 = vpop.eup %1509  ;;  %v731_v50 = vadd.f32 1.0, %v1508_v44  ;;  %v736_v61 = vmul.f32 0.5, %v728_v43  ;;  %v743_v4 = vmul.f32 %v735_v49, %v1933_v47 }
 0x20b   : > { %v1512_v53 = vpop.eup %1511  ;;  %v733_v55 = vadd.f32 1.0, %v1510_v46  ;;  %v738_v0 = vmul.f32 0.5, %v730_v45  ;;  %v745_v1 = vmul.f32 %v737_v54, %v1935_v48 }
 0x20c   : > { %v1514_v56 = vpop.eup %1513  ;;  %v739_v59 = vmul.f32 0.5, %v731_v50  ;;  %v732_v60 = vadd.f32 1.0, %v1512_v53  ;;  %v744_v9 = vmul.f32 %v736_v61, %v1937_v51  ;;  %v1255_v51 = vld [vmem:[%s2050_s6] ss:$0 sm:$0xff] }
 0x20d   : > { %v741_v62 = vmul.f32 0.5, %v733_v55  ;;  %v734_v3 = vadd.f32 1.0, %v1514_v56  ;;  %v746_v12 = vmul.f32 %v738_v0, %v1939_v52 }
 0x20e   : > { %v747_v5 = vmul.f32 %v739_v59, %v1945_v57  ;;  %v740_v6 = vmul.f32 0.5, %v732_v60 }
 0x20f   : > { %v749_v7 = vmul.f32 %v741_v62, %v1947_v58  ;;  %v742_v8 = vmul.f32 0.5, %v734_v3 }
 0x210   : > { %v748_v10 = vmul.f32 %v740_v6, %v1953_v63  ;;  %v751_v11 = vpack.c.bf16 %v747_v5, %v743_v4 }
 0x211   : > { %v750_v13 = vmul.f32 %v742_v8, %v1955_v2  ;;  %v753_v14 = vpack.c.bf16 %v749_v7, %v745_v1 }
 0x212   : > { %v752_v47 = vpack.c.bf16 %v748_v10, %v744_v9 }
 0x213   : > { %v754_v15 = vpack.c.bf16 %v750_v13, %v746_v12 }
 0x214   : > { %1050 = vmatprep.mubr.bf16.mxu0 %v752_v47 }
 0x215   : > { %1091 = vmatprep.mubr.bf16.mxu1 %v754_v15  ;;  %1051 = vmatmul.mubr.bf16.vlgmr.msra.gmra.mrb[4].mxu0 %v751_v11 }
 0x216   : > { %1092 = vmatmul.mubr.bf16.vlgmr.msra.gmra.mrb[4].mxu1 %v753_v14 }
 0x2e8   : > { %v1311_v48 = vpop.f32.mrb[4].mxu0 }
 0x2e9   : > { %v1333_v57 = vpop.f32.mrb[4].mxu1  ;;  %v1312_v58 = vpop.f32.mrb[5].mxu0 }
 0x2ea   : > { %v1313_v63 = vadd.f32 %v1312_v58, %v1311_v48  ;;  %v1334_v52 = vpop.f32.mrb[5].mxu1  ;;  %v1314_v16 = vpop.f32.mrb[6].mxu0 }
 0x2eb   : > { %v1335_v2 = vadd.f32 %v1334_v52, %v1333_v57  ;;  %v1336_v17 = vpop.f32.mrb[6].mxu1  ;;  %v1315_v18 = vpop.f32.mrb[7].mxu0 }
 0x2ec   : > { %v1053_v19 = vadd.f32 %v1313_v63, %v1255_v51  ;;  %v1316_v20 = vadd.f32 %v1315_v18, %v1314_v16  ;;  %v1337_v21 = vpop.f32.mrb[7].mxu1 }
 0x2ed   : > { %v1338_v22 = vadd.f32 %v1337_v21, %v1336_v17 }
 0x2ee   : > { %v1094_v23 = vadd.f32 %v1335_v2, %v1053_v19  ;;  %v1056_v24 = vadd.f32 %v1316_v20, %v1255_v51 }
 0x2f0   : > { %1100 = vst [vmem:[%s325_s15] sm:$0xff] %v1094_v23  ;;  %v1097_v25 = vadd.f32 %v1338_v22, %v1056_v24 }
 0x2f2   : > { %1101 = vst [vmem:[%s325_s15 + $0x8] sm:$0xff] %v1097_v25 }
 0x2f3   : > { %1614 = shalt.err (!%p1611_p2)
}
 0x2f4   : > { %s1615_s10 = scalar_lea.hbm %s2000_s21, 256  ;;  %s1619_s15 = scalar_lea.hbm %s2051_s7, 512 }
 0x2f5   : > { %p1616_p13 = scmp.ne.s32.totalorder %s2000_s21, %s1615_s10  ;;  %p1620_p4 = scmp.lt.u32.totalorder %s2000_s21, %s2051_s7 }
 0x2f6   : > { %p1621_p7 = scmp.lt.u32.totalorder %s1619_s15, %s1615_s10  ;;  %p1623_p11 = scmp.lt.u32.totalorder %s1615_s10, %s2000_s21 }
 0x2f7   : > { %p1617_p6 = pnand %p1616_p13, %p2065_p0 }
 0x2f8   : > { %p1622_p8 = por %p1621_p7, %p1620_p4 }
 0x2f9   : > { %p1618_p10 = pneg %p1617_p6 }
 0x2fa   : > { %p1624_p1 = por %p1623_p11, %p1622_p8 }
 0x2fc   : > { %p1625_p3 = pnand %p1624_p1, %p1618_p10 }
 0x2fe   : > { %1628 = shalt.err (!%p1625_p3)
}
 0x2ff   : > { %s1684_s30 = smov 128   ;;  %s1685_s11 = smov 8  }
 0x300   : > { %1349 = dma.vmem_to_hbm [thread:$0]  (%p2065_p0), %s1995_s14, 256, %s2000_s21, %s1103_s9, %s1684_s30, %s1684_s30, %s1685_s11  }
 0x301 PF: > { %s1131_s28 = sand.u32 1, %s1659_s24   ;;  %p2066_p5 = scmp.ne.s32.totalorder %s2056_s8, 0 }
 0x302   : > { %p2067_p9 = scmp.ge.s32.totalorder %s1671_s27, 2  ;;  %s1132_s23 = scalar_lea.sflag [#allocation4], %s1131_s28 }
 0x304   : > { %p1363_p12 = pnand %p2067_p9, %p2066_p5 }
 0x306   : > { %1654 = dma.done.wait (!%p1363_p12), %s1132_s23, 256  }
 0x307   : > { %1656 = vsyncadd (!%p1363_p12), %s1132_s23, 4294967040  ;;  %p21_p2 = scmp.ge.s32.totalorder %s1836_s13, 4   ;;  %s2068_s24 = smov %s1663_s25 }
 0x308   : > { %s2069_s25 = smov %s1667_s26  ;;  %s2070_s26 = smov %s1845_s17 }
 0x309   : > { %s2071_s27 = smov %s1836_s13  ;;  %23 = sbr.rel (!%p21_p2) target bundleno = 6 (0x6), region = 101 }
 0x310   :  { %1137 = vsyncpa [#allocation3], 1 }
 0x311   :  { %1139 = vsyncpa [#allocation3 + $0x1], 1 }
 0x312   :  { %1140 = vsyncpa [#allocation6], 1 }
 0x313   :  { %1141 = vsyncpa [#allocation4], 1 }
 0x314   :  { %1143 = vsyncpa [#allocation4 + $0x1], 1 }

// kernel: tpu_custom_call.1
= control target key start
LH: loop header
LB: loop body
LE: loop exit
PB: predicated region body
PF: predicated region fallthrough
CT: control target
= control target key end

     0   :  { %12 = vsyncpa [#allocation3], 0  ;;  %s2044_s0 = inlined_call_operand.hbm [shape: f32[32,128], index: 0, kind: input, shape index: {}]   ;;  %s2045_s1 = inlined_call_operand.vmem [shape: f32[1,128], index: 1, kind: input, shape index: {}]   ;;  %s2046_s2 = inlined_call_operand.vmem [shape: f32[1,128], index: 2, kind: input, shape index: {}]   ;;  %s2047_s3 = inlined_call_operand.hbm [shape: bf16[128,512], index: 3, kind: input, shape index: {}]   ;;  %s2048_s4 = inlined_call_operand.vmem [shape: f32[1,512], index: 4, kind: input, shape index: {}]   ;;  %s2049_s5 = inlined_call_operand.hbm [shape: bf16[512,128], index: 5, kind: input, shape index: {}]   ;;  %s2050_s6 = inlined_call_operand.vmem [shape: f32[1,128], index: 6, kind: input, shape index: {}]   ;;  %s2051_s7 = inlined_call_operand.hbm [shape: f32[32,128], index: 7, kind: output, shape index: {}]  }
   0x1   :  { %14 = vsyncpa [#allocation3 + $0x1], 0 }
   0x2   :  { %15 = vsyncpa [#allocation6], 0 }
   0x3   :  { %16 = vsyncpa [#allocation4], 0 }
   0x4   :  { %18 = vsyncpa [#allocation4 + $0x1], 0  ;;  %s1726_s24 = smov 0   ;;  %s1728_s25 = smov 0  }
   0x5   :  { %s1730_s26 = smov 0   ;;  %s1732_s27 = smov 0  }
   0x6 LB: > { %s1747_s28 = sadd.s32 4294967295, %s1671_s27   ;;  %s1208_s29 = sadd.s32 4294967294, %s1671_s27   ;;  %s1671_s27 = sphi %s1732_s27, %s2071_s27   ;;  %s1667_s26 = sphi %s1730_s26, %s2070_s26   ;;  %s1663_s25 = sphi %s1728_s25, %s2069_s25   ;;  %s1659_s24 = sphi %s1726_s24, %s2068_s24  }
   0x7   : > { %p44_p0 = scmp.ne.s32.totalorder %s1663_s25, %s1659_s24  ;;  %p2052_p1 = scmp.eq.s32.totalorder %s1747_s28, 0 }
   0x8   : > { %p200_p3 = scmp.eq.s32.totalorder %s1208_s29, 1  ;;  %p1209_p5 = scmp.ge.s32.totalorder %s1671_s27, 1 }
   0x9   : > { %p1756_p4 = por %p2052_p1, %p44_p0  ;;  %p207_p7 = scmp.lt.s32.totalorder %s1671_s27, 3 }
   0xa   : > { %p1761_p6 = por %p200_p3, %p44_p0  ;;  %s1673_s10 = smov [#allocation5]  }
   0xb   : > { %s2055_s30 = scalar_select %p1756_p4, 1, 0 }
   0xc   : > { %s2056_s8 = scalar_select %p1761_p6, 1, 0 }
   0xd   : > { %p1766_p8 = pnand %p1209_p5, %p207_p7  ;;  %s225_s11 = sshll.u32 %s1673_s10, 4  ;;  %s1770_s11 = int_to_ptr.vmem [resolvable:$true] %s225_s11 }
   0xe   : > { %s1674_s13 = smov [#allocation7]   ;;  %s1515_s17 = scalar_lea.hbm %s2047_s3, 4096 }
   0xf   : > { %p1351_p9 = pneg %p1766_p8  ;;  %s241_s14 = sshll.u32 %s1674_s13, 4  ;;  %s1781_s14 = int_to_ptr.vmem [resolvable:$true] %s241_s14 }
  0x10   : > { %p1516_p12 = scmp.ne.s32.totalorder %s2047_s3, %s1515_s17  ;;  %p1522_p5 = scmp.lt.u32.totalorder %s1515_s17, %s2047_s3 }
  0x11   : > { %p1777_p11 = pnand %p1351_p9, %p2052_p1 }
  0x13   : > { %p1517_p13 = pneg %p1777_p11 }
  0x15   : > { %p1518_p0 = pnand %p1517_p13, %p1516_p12 }
  0x17   : > { %p1519_p3 = pneg %p1518_p0 }
  0x19   : > { %p1524_p7 = pnand %p1522_p5, %p1519_p3 }
  0x1b   : > { %1527 = shalt.err (!%p1524_p7)
}
  0x1c   : > { %s1528_s22 = scalar_lea.vmem %s1770_s11, 4096  ;;  %p1536_p2 = scmp.lt.s32.totalorder %s1770_s11, %s1770_s11 }
  0x1d   : > { %p1529_p9 = scmp.ne.s32.totalorder %s1770_s11, %s1528_s22  ;;  %p1537_p12 = scmp.lt.s32.totalorder %s1528_s22, %s1528_s22 }
  0x1f   : > { %p1531_p10 = pnand %p1529_p9, %p1517_p13  ;;  %p1538_p0 = por %p1537_p12, %p1536_p2 }
  0x21   : > { %p1532_p1 = pneg %p1531_p10 }
  0x23   : > { %p1539_p6 = pnand %p1538_p0, %p1532_p1 }
  0x25   : > { %1542 = shalt.err (!%p1539_p6)
}
  0x26   : > { %s1675_s23 = smov 256   ;;  %s1676_s29 = smov 16  }
  0x27   : > { %1354 = dma.hbm_to_vmem [thread:$0]  (!%p1777_p11), %s2047_s3, 4096, %s1770_s11, [#allocation6], %s1675_s23, %s1675_s23, %s1676_s29  }
  0x28   : > { %s1543_s17 = scalar_lea.hbm %s2049_s5, 4096 }
  0x29   : > { %p1544_p2 = scmp.ne.s32.totalorder %s2049_s5, %s1543_s17  ;;  %p1550_p10 = scmp.lt.u32.totalorder %s1543_s17, %s2049_s5 }
  0x2b   : > { %p1546_p1 = pnand %p1544_p2, %p1517_p13 }
  0x2d   : > { %p1547_p6 = pneg %p1546_p1 }
  0x2f   : > { %p1552_p3 = pnand %p1550_p10, %p1547_p6 }
  0x31   : > { %1555 = shalt.err (!%p1552_p3)
}
  0x32   : > { %s1556_s11 = scalar_lea.vmem %s1781_s14, 4096  ;;  %p1564_p12 = scmp.lt.s32.totalorder %s1781_s14, %s1781_s14 }
  0x33   : > { %p1557_p5 = scmp.ne.s32.totalorder %s1781_s14, %s1556_s11  ;;  %p1565_p0 = scmp.lt.s32.totalorder %s1556_s11, %s1556_s11 }
  0x35   : > { %p1559_p7 = pnand %p1557_p5, %p1517_p13  ;;  %p1566_p2 = por %p1565_p0, %p1564_p12 }
  0x37   : > { %p1560_p9 = pneg %p1559_p7 }
  0x39   : > { %p1567_p1 = pnand %p1566_p2, %p1560_p9 }
  0x3b   : > { %1570 = shalt.err (!%p1567_p1)
}
  0x3c   : > { %s1677_s22 = smov 64   ;;  %s1678_s23 = smov 4  }
  0x3d   : > { %1357 = dma.hbm_to_vmem [thread:$0]  (!%p1777_p11), %s2049_s5, 4096, %s1781_s14, [#allocation6], %s1677_s22, %s1677_s22, %s1678_s23  }
  0x3e   : > { %s1836_s13 = sadd.s32 1, %s1671_s27   ;;  %s31_s16 = sadd.s32 1, %s1667_s26 }
  0x3f   : > { %s28_s15 = ssub.s32 %s1671_s27, %s1836_s13  ;;  %p38_p6 = scmp.ne.s32.totalorder %s1667_s26, %s1663_s25 }
  0x40   : > { %p29_p13 = scmp.eq.s32.totalorder %s28_s15, 0  ;;  %p39_p10 = scmp.eq.s32.totalorder %s1671_s27, 0 }
  0x41   : > { %p2059_p5 = scmp.eq.s32.totalorder %s1747_s28, 1  ;;  %p1368_p9 = scmp.lt.s32.totalorder %s1671_s27, 2 }
  0x42   : > { %s1845_s17 = scalar_select %p29_p13, %s1667_s26, %s31_s16  }
  0x43   : > { %p40_p3 = por %p39_p10, %p38_p6  ;;  %p1849_p7 = por %p2059_p5, %p38_p6 }
  0x44   : > { %s258_s12 = sand.u32 1, %s1667_s26   ;;  %s1293_s14 = sshll.u32 %s1671_s27, 8 }
  0x45   : > { %s2060_s18 = scalar_select %p1849_p7, 1, 0 }
  0x46   : > { %s1213_s19 = sshll.u32 %s258_s12, 4  ;;  %s1859_s11 = scalar_lea.hbm %s2044_s0, %s1293_s14 }
  0x47   : > { %s262_s22 = scalar_lea.vmem [#allocation2], %s1213_s19  ;;  %p1863_p11 = pnand %p1368_p9, %p40_p3 }
  0x48   : > { %s269_s23 = sshll.u32 %s262_s22, 4  ;;  %s1867_s10 = scalar_lea.sflag [#allocation3], %s258_s12  ;;  %s1861_s23 = int_to_ptr.vmem [resolvable:$true] %s269_s23 }
  0x49   : > { %s1571_s15 = scalar_lea.hbm %s1859_s11, 256  ;;  %p1573_p0 = pneg %p1863_p11 }
  0x4a   : > { %p1572_p12 = scmp.ne.s32.totalorder %s1859_s11, %s1571_s15  ;;  %s1576_s14 = scalar_lea.hbm %s2044_s0, 512 }
  0x4b   : > { %p1577_p13 = scmp.lt.u32.totalorder %s1859_s11, %s2044_s0  ;;  %p1578_p6 = scmp.lt.u32.totalorder %s1576_s14, %s1571_s15 }
  0x4c   : > { %p1574_p2 = pnand %p1573_p0, %p1572_p12  ;;  %p1580_p3 = scmp.lt.u32.totalorder %s1571_s15, %s1859_s11 }
  0x4d   : > { %p1579_p10 = por %p1578_p6, %p1577_p13 }
  0x4e   : > { %p1575_p1 = pneg %p1574_p2 }
  0x4f   : > { %p1581_p5 = por %p1580_p3, %p1579_p10 }
  0x51   : > { %p1582_p9 = pnand %p1581_p5, %p1575_p1 }
  0x53   : > { %1585 = shalt.err (!%p1582_p9)
}
  0x54   : > { %s1586_s12 = scalar_lea.vmem %s1861_s23, 256  ;;  %s1679_s22 = smov [#allocation2]  }
  0x55   : > { %p1587_p12 = scmp.ne.s32.totalorder %s1861_s23, %s1586_s12  ;;  %s1591_s16 = sshll.u32 %s1679_s22, 4  ;;  %s1592_s16 = int_to_ptr.vmem [resolvable:$false] %s1591_s16 }
  0x56   : > { %s1593_s19 = scalar_lea.vmem %s1592_s16, 512  ;;  %p1594_p4 = scmp.lt.s32.totalorder %s1861_s23, %s1592_s16 }
  0x57   : > { %p1589_p2 = pnand %p1587_p12, %p1573_p0  ;;  %p1595_p13 = scmp.lt.s32.totalorder %s1593_s19, %s1586_s12 }
  0x59   : > { %p1590_p7 = pneg %p1589_p2  ;;  %p1596_p6 = por %p1595_p13, %p1594_p4 }
  0x5b   : > { %p1597_p10 = pnand %p1596_p6, %p1590_p7 }
  0x5d   : > { %1600 = shalt.err (!%p1597_p10)
}
  0x5e   : > { %s1680_s15 = smov 128   ;;  %s1681_s14 = smov 8  }
  0x5f   : > { %1361 = dma.hbm_to_vmem [thread:$0]  (!%p1863_p11), %s1859_s11, 256, %s1861_s23, %s1867_s10, %s1680_s15, %s1680_s15, %s1681_s14  }
  0x60   : > { %281 = sbr.rel (%p1766_p8) target bundleno = 769 (0x301), region = 48  ;;  %s1898_s20 = sand.u32 (!%p1766_p8), 1, %s1663_s25  }
  0x61   : > { %s1217_s21 = sshll.u32 (!%p1766_p8), %s1898_s20, 4  ;;  %s284_s12 = scalar_lea.sflag (!%p1766_p8), [#allocation3], %s1898_s20 }
  0x62   : > { %s287_s22 = scalar_lea.vmem (!%p1766_p8), [#allocation2], %s1217_s21  ;;  %p2062_p4 = scmp.ne.s32.totalorder (!%p1766_p8), %s2055_s30, 0 }
  0x67   : > { %1646 = dma.done.wait (%p2062_p4), %s284_s12, 256  }
  0x68   : > { %1648 = vsyncadd (%p2062_p4), %s284_s12, 4294967040  ;;  %p2063_p7 = scmp.eq.s32.totalorder %s1747_s28, 0 }
  0x6a   : > { %1650 = dma.done.wait (%p2063_p7), [#allocation6], 8192   ;;  %p2064_p8 = pmov %p2063_p7 }
  0x6b   : > { %v1912_v0 = vld [vmem:[%s287_s22] sm:$0xff]  ;;  %v1914_v1 = vld [vmem:[%s287_s22 + $0x8] sm:$0xff]  ;;  %v1682_v32 = vmov 0   ;;  %s325_s15 = scalar_lea.vmem [#allocation8], %s1217_s21  ;;  %s1294_s12 = sshll.u32 %s1747_s28, 8 }
  0x6c   : > { %1652 = vsyncadd (%p2064_p8), [#allocation6], 4294959104  ;;  %331 = vadd.xlane.f32.xlu0 %v1912_v0  ;;  %v338_v2 = vmul.f32 %v1912_v0, %v1912_v0  ;;  %v339_v3 = vmul.f32 %v1914_v1, %v1914_v1  ;;  %v1415_v4 = vld [vmem:[#allocation5 + $0x4] ss:$16 sps:$4 sm:$0xff]   ;;  %v1417_v5 = vld [vmem:[#allocation5 + $0xc] ss:$16 sps:$4 sm:$0xff]   ;;  %625 = vmatprep.mubr.bf16.mxu0 %v1682_v32  ;;  %s2000_s21 = scalar_lea.hbm %s2051_s7, %s1294_s12 }
  0x6d   : > { %v1419_v6 = vld [vmem:[#allocation5] ss:$16 sps:$4 sm:$0xff]   ;;  %v1420_v7 = vld [vmem:[#allocation5 + $0x8] ss:$16 sps:$4 sm:$0xff]   ;;  %593 = vmatprep.subr.bf16.mxu0 %v1415_v4  ;;  %636 = vmatprep.subr.bf16.mxu1 %v1417_v5  ;;  %v1421_v8 = vld [vmem:[#allocation5 + $0x24] ss:$16 sps:$4 sm:$0xff]  }
  0x6e   : > { %340 = vadd.xlane.f32.xlu1 %v338_v2  ;;  %594 = vmatpush1.bf16.msra.mxu0 %v1419_v6  ;;  %v1423_v9 = vld [vmem:[#allocation5 + $0x2c] ss:$16 sps:$4 sm:$0xff]   ;;  %v1425_v10 = vld [vmem:[#allocation5 + $0x20] ss:$16 sps:$4 sm:$0xff]   ;;  %v1426_v11 = vld [vmem:[#allocation5 + $0x28] ss:$16 sps:$4 sm:$0xff]  }
  0x6f   : > { %637 = vmatpush1.bf16.msra.mxu1 %v1420_v7  ;;  %595 = vmatprep.subr.bf16.mxu0 %v1421_v8  ;;  %v1427_v12 = vld [vmem:[#allocation5 + $0x44] ss:$16 sps:$4 sm:$0xff]   ;;  %v1429_v13 = vld [vmem:[#allocation5 + $0x4c] ss:$16 sps:$4 sm:$0xff]   ;;  %v1431_v14 = vld [vmem:[#allocation5 + $0x40] ss:$16 sps:$4 sm:$0xff]  }
  0x70   : > { %333 = vadd.xlane.f32.xlu0 %v1914_v1  ;;  %638 = vmatprep.subr.bf16.mxu1 %v1423_v9  ;;  %v1432_v15 = vld [vmem:[#allocation5 + $0x48] ss:$16 sps:$4 sm:$0xff]   ;;  %v1433_v16 = vld [vmem:[#allocation5 + $0x64] ss:$16 sps:$4 sm:$0xff]   ;;  %v1435_v17 = vld [vmem:[#allocation5 + $0x6c] ss:$16 sps:$4 sm:$0xff]  }
  0x71   : > { %v1437_v18 = vld [vmem:[#allocation5 + $0x60] ss:$16 sps:$4 sm:$0xff]   ;;  %v1438_v19 = vld [vmem:[#allocation5 + $0x68] ss:$16 sps:$4 sm:$0xff]   ;;  %v1439_v20 = vld [vmem:[#allocation5 + $0x84] ss:$16 sps:$4 sm:$0xff]   ;;  %668 = vmatprep.mubr.bf16.mxu1 %v1682_v32 }
  0x72   : > { %342 = vadd.xlane.f32.xlu1 %v339_v3  ;;  %596 = vmatpush1.bf16.msra.mxu0 %v1425_v10  ;;  %v1441_v21 = vld [vmem:[#allocation5 + $0x8c] ss:$16 sps:$4 sm:$0xff]   ;;  %v1443_v22 = vld [vmem:[#allocation5 + $0x80] ss:$16 sps:$4 sm:$0xff]   ;;  %v1444_v23 = vld [vmem:[#allocation5 + $0x88] ss:$16 sps:$4 sm:$0xff]  }
  0x73   : > { %639 = vmatpush1.bf16.msra.mxu1 %v1426_v11  ;;  %597 = vmatprep.subr.bf16.mxu0 %v1427_v12  ;;  %v1445_v24 = vld [vmem:[#allocation5 + $0xa4] ss:$16 sps:$4 sm:$0xff]   ;;  %v1447_v25 = vld [vmem:[#allocation5 + $0xac] ss:$16 sps:$4 sm:$0xff]   ;;  %v1449_v26 = vld [vmem:[#allocation5 + $0xa0] ss:$16 sps:$4 sm:$0xff]  }
  0x74   : > { %640 = vmatprep.subr.bf16.mxu1 %v1429_v13  ;;  %v1450_v27 = vld [vmem:[#allocation5 + $0xa8] ss:$16 sps:$4 sm:$0xff]   ;;  %v1451_v28 = vld [vmem:[#allocation5 + $0xc4] ss:$16 sps:$4 sm:$0xff]   ;;  %v1453_v29 = vld [vmem:[#allocation5 + $0xcc] ss:$16 sps:$4 sm:$0xff]  }
  0x75   : > { %v1455_v30 = vld [vmem:[#allocation5 + $0xc0] ss:$16 sps:$4 sm:$0xff]   ;;  %v1456_v31 = vld [vmem:[#allocation5 + $0xc8] ss:$16 sps:$4 sm:$0xff]   ;;  %v1457_v33 = vld [vmem:[#allocation5 + $0xe4] ss:$16 sps:$4 sm:$0xff]  }
  0x76   : > { %598 = vmatpush1.bf16.msra.mxu0 %v1431_v14  ;;  %v1459_v34 = vld [vmem:[#allocation5 + $0xec] ss:$16 sps:$4 sm:$0xff]   ;;  %v1461_v35 = vld [vmem:[#allocation5 + $0xe0] ss:$16 sps:$4 sm:$0xff]   ;;  %v1462_v36 = vld [vmem:[#allocation5 + $0xe8] ss:$16 sps:$4 sm:$0xff]  }
  0x77   : > { %641 = vmatpush1.bf16.msra.mxu1 %v1432_v15  ;;  %599 = vmatprep.subr.bf16.mxu0 %v1433_v16  ;;  %v1221_v56 = vld [vmem:[%s2045_s1] ss:$0 sm:$0xff]  ;;  %v1468_v7 = vld [vmem:[#allocation7 + $0xc8] sm:$0xff]   ;;  %v1471_v10 = vld [vmem:[#allocation7 + $0x50] sm:$0xff]   ;;  %s1116_s14 = sshll.u32 %s325_s15, 4  ;;  %s1103_s9 = scalar_lea.sflag [#allocation4], %s1898_s20  ;;  %s1995_s14 = int_to_ptr.vmem [resolvable:$true] %s1116_s14 }
  0x78   : > { %642 = vmatprep.subr.bf16.mxu1 %v1435_v17  ;;  %v1222_v61 = vld [vmem:[%s2046_s2] ss:$0 sm:$0xff]  ;;  %v1469_v8 = vld [vmem:[#allocation7 + $0x8] sm:$0xff]   ;;  %v1472_v11 = vld [vmem:[#allocation7 + $0xd0] sm:$0xff]   ;;  %s1601_s11 = scalar_lea.vmem %s1995_s14, 256  ;;  %p2065_p0 = scmp.ne.s32.totalorder %s2060_s18, 0 }
  0x79   : > { %v1464_v4 = vld [vmem:[#allocation7 + $0xc0] sm:$0xff]   ;;  %v1470_v9 = vld [vmem:[#allocation7 + $0x88] sm:$0xff]   ;;  %v1473_v12 = vld [vmem:[#allocation7 + $0x10] sm:$0xff]   ;;  %p1602_p11 = scmp.ne.s32.totalorder %s1995_s14, %s1601_s11  ;;  %s1683_s28 = smov [#allocation8]  }
  0x7a   : > { %600 = vmatpush1.bf16.msra.mxu0 %v1437_v18  ;;  %v1465_v5 = vld [vmem:[#allocation7] sm:$0xff]   ;;  %v1474_v13 = vld [vmem:[#allocation7 + $0x90] sm:$0xff]   ;;  %v1475_v14 = vld [vmem:[#allocation7 + $0x58] sm:$0xff]   ;;  %s1605_s23 = sshll.u32 %s1683_s28, 4  ;;  %s1606_s23 = int_to_ptr.vmem [resolvable:$false] %s1605_s23 }
  0x7b   : > { %643 = vmatpush1.bf16.msra.mxu1 %v1438_v19  ;;  %601 = vmatprep.subr.bf16.mxu0 %v1439_v20  ;;  %v1466_v6 = vld [vmem:[#allocation7 + $0x80] sm:$0xff]   ;;  %v1476_v15 = vld [vmem:[#allocation7 + $0xd8] sm:$0xff]   ;;  %p1603_p1 = pnand %p1602_p11, %p2065_p0  ;;  %s1607_s29 = scalar_lea.vmem %s1606_s23, 512 }
  0x7c   : > { %644 = vmatprep.subr.bf16.mxu1 %v1441_v21  ;;  %v1477_v16 = vld [vmem:[#allocation7 + $0x18] sm:$0xff]   ;;  %v1479_v18 = vld [vmem:[#allocation7 + $0x60] sm:$0xff]   ;;  %p1608_p5 = scmp.lt.s32.totalorder %s1995_s14, %s1606_s23  ;;  %p1609_p9 = scmp.lt.s32.totalorder %s1607_s29, %s1601_s11 }
  0x7d   : > { %v1478_v17 = vld [vmem:[#allocation7 + $0x98] sm:$0xff]   ;;  %v1480_v19 = vld [vmem:[#allocation7 + $0xe0] sm:$0xff]   ;;  %p1604_p3 = pneg %p1603_p1 }
  0x7e   : > { %602 = vmatpush1.bf16.msra.mxu0 %v1443_v22  ;;  %v1481_v20 = vld [vmem:[#allocation7 + $0x20] sm:$0xff]   ;;  %v1483_v22 = vld [vmem:[#allocation7 + $0x68] sm:$0xff]   ;;  %v1493_v32 = vld [vmem:[#allocation7 + $0x38] sm:$0xff]   ;;  %p1610_p12 = por %p1609_p9, %p1608_p5 }
  0x7f   : > { %645 = vmatpush1.bf16.msra.mxu1 %v1444_v23  ;;  %603 = vmatprep.subr.bf16.mxu0 %v1445_v24  ;;  %v1482_v21 = vld [vmem:[#allocation7 + $0xa0] sm:$0xff]   ;;  %v1484_v23 = vld [vmem:[#allocation7 + $0xe8] sm:$0xff]  }
  0x80   : > { %646 = vmatprep.subr.bf16.mxu1 %v1447_v25  ;;  %v1485_v24 = vld [vmem:[#allocation7 + $0x28] sm:$0xff]   ;;  %p1611_p2 = pnand %p1610_p12, %p1604_p3 }
  0x81   : > { %v1486_v25 = vld [vmem:[#allocation7 + $0xa8] sm:$0xff]  }
  0x82   : > { %604 = vmatpush1.bf16.msra.mxu0 %v1449_v26  ;;  %v1487_v26 = vld [vmem:[#allocation7 + $0x70] sm:$0xff]  }
  0x83   : > { %647 = vmatpush1.bf16.msra.mxu1 %v1450_v27  ;;  %605 = vmatprep.subr.bf16.mxu0 %v1451_v28  ;;  %v1488_v27 = vld [vmem:[#allocation7 + $0xf0] sm:$0xff]  }
  0x84   : > { %648 = vmatprep.subr.bf16.mxu1 %v1453_v29  ;;  %v1489_v28 = vld [vmem:[#allocation7 + $0x30] sm:$0xff]  }
  0x85   : > { %v1490_v29 = vld [vmem:[#allocation7 + $0xb0] sm:$0xff]  }
  0x86   : > { %606 = vmatpush1.bf16.msra.mxu0 %v1455_v30  ;;  %v1491_v30 = vld [vmem:[#allocation7 + $0x78] sm:$0xff]  }
  0x87   : > { %649 = vmatpush1.bf16.msra.mxu1 %v1456_v31  ;;  %607 = vmatprep.subr.bf16.mxu0 %v1457_v33  ;;  %v1492_v31 = vld [vmem:[#allocation7 + $0xf8] sm:$0xff]  }
  0x88   : > { %650 = vmatprep.subr.bf16.mxu1 %v1459_v34  ;;  %v1494_v33 = vld [vmem:[#allocation7 + $0xb8] sm:$0xff]   ;;  %v413_v34 = vlaneseq }
  0x8a   : > { %608 = vmatpush1.bf16.msra.mxu0 %v1461_v35  ;;  %v414_v35 = vshrl.u32 %v413_v34, 7 }
  0x8b   : > { %651 = vmatpush1.bf16.msra.mxu1 %v1462_v36 }
  0x8c   : > { %1317 = vmatprep.subr.bf16.mxu1 %v1464_v4  ;;  %v415_v36 = vsub.s32 0, %v414_v35 }
  0xf9   : > { %v332_v37 = vpop.xlane.xlu0 %331 }
  0xfa   : > { %v336_v38 = vmul.f32 0.0078125, %v332_v37  ;;  %v423_v37 = vsub.s32 2, %v414_v35 }
  0xfb   : > { %v341_v39 = vpop.xlane.xlu1 %340 }
  0xfc   : > { %v346_v40 = vmul.f32 %v336_v38, %v336_v38  ;;  %v344_v41 = vmul.f32 0.0078125, %v341_v39  ;;  %v352_v53 = vsub.f32 %v1912_v0, %v336_v38  ;;  %v1463_v0 = vld [vmem:[#allocation7 + $0x40] sm:$0xff]   ;;  %v419_v39 = vsub.s32 1, %v414_v35 }
  0xfd   : > { %v334_v42 = vpop.xlane.xlu0 %333  ;;  %1295 = vmatprep.subr.bf16.mxu0 %v1463_v0  ;;  %v411_v38 = vld [vmem:[%s2048_s4] sm:$0xf] }
  0xfe   : > { %v348_v43 = vsub.f32 %v344_v41, %v346_v40  ;;  %v337_v44 = vmul.f32 0.0078125, %v334_v42  ;;  %v427_v40 = vsub.s32 3, %v414_v35  ;;  %v416_v41 = vrot.slane %v411_v38, %v415_v36 }
  0xff   : > { %v343_v45 = vpop.xlane.xlu1 %342  ;;  %v424_v42 = vrot.slane %v411_v38, %v423_v37 }
 0x100   : > { %v350_v46 = vmax.f32 %v348_v43, 0.0  ;;  %v347_v47 = vmul.f32 %v337_v44, %v337_v44  ;;  %v345_v48 = vmul.f32 0.0078125, %v343_v45  ;;  %v353_v57 = vsub.f32 %v1914_v1, %v337_v44  ;;  %v1467_v1 = vld [vmem:[#allocation7 + $0x48] sm:$0xff]  }
 0x101   : > { %v420_v43 = vrot.slane %v411_v38, %v419_v39  ;;  %v428_v44 = vrot.slane %v411_v38, %v427_v40 }
 0x102   : > { %v354_v49 = vadd.f32 1e-05, %v350_v46  ;;  %v349_v50 = vsub.f32 %v345_v48, %v347_v47 }
 0x104   : > { %1495 = vrsqrt.f32 %v354_v49  ;;  %v351_v51 = vmax.f32 %v349_v50, 0.0 }
 0x106   : > { %v355_v52 = vadd.f32 1e-05, %v351_v51 }
 0x108   : > { %1497 = vrsqrt.f32 %v355_v52 }
 0x10e   : > { %v1496_v54 = vpop.eup %1495 }
 0x10f   : > { %v358_v55 = vmul.f32 %v1496_v54, %v352_v53 }
 0x111   : > { %v367_v60 = vmul.f32 %v1221_v56, %v358_v55 }
 0x112   : > { %v1498_v58 = vpop.eup %1497 }
 0x113   : > { %v359_v59 = vmul.f32 %v1498_v58, %v353_v57  ;;  %v376_v63 = vadd.f32 %v1222_v61, %v367_v60 }
 0x115   : > { %v368_v62 = vmul.f32 %v1221_v56, %v359_v59 }
 0x117   : > { %v377_v2 = vadd.f32 %v1222_v61, %v368_v62 }
 0x119   : > { %v378_v3 = vpack.c.bf16 %v377_v2, %v376_v63 }
 0x11b   : > { %626 = vmatmul.mubr.bf16.vlgmr.msra.gmra.mrb[0].mxu0 %v378_v3  ;;  %669 = vmatmul.mubr.bf16.vlgmr.msra.gmra.mrb[0].mxu1 %v378_v3 }
 0x11c   : > { %1296 = vmatpush3.bf16.msra.mxu0 %v1465_v5  ;;  %1318 = vmatpush3.bf16.msra.mxu1 %v1466_v6 }
 0x11d   : > { %1297 = vmatprep.subr.bf16.mxu0 %v1467_v1  ;;  %1319 = vmatprep.subr.bf16.mxu1 %v1468_v7 }
 0x120   : > { %1298 = vmatpush3.bf16.msra.mxu0 %v1469_v8  ;;  %1320 = vmatpush3.bf16.msra.mxu1 %v1470_v9 }
 0x121   : > { %1299 = vmatprep.subr.bf16.mxu0 %v1471_v10  ;;  %1321 = vmatprep.subr.bf16.mxu1 %v1472_v11 }
 0x124   : > { %1300 = vmatpush3.bf16.msra.mxu0 %v1473_v12  ;;  %1322 = vmatpush3.bf16.msra.mxu1 %v1474_v13 }
 0x125   : > { %1301 = vmatprep.subr.bf16.mxu0 %v1475_v14  ;;  %1323 = vmatprep.subr.bf16.mxu1 %v1476_v15 }
 0x128   : > { %1302 = vmatpush3.bf16.msra.mxu0 %v1477_v16  ;;  %1324 = vmatpush3.bf16.msra.mxu1 %v1478_v17 }
 0x129   : > { %1303 = vmatprep.subr.bf16.mxu0 %v1479_v18  ;;  %1325 = vmatprep.subr.bf16.mxu1 %v1480_v19 }
 0x12c   : > { %1304 = vmatpush3.bf16.msra.mxu0 %v1481_v20  ;;  %1326 = vmatpush3.bf16.msra.mxu1 %v1482_v21 }
 0x12d   : > { %1305 = vmatprep.subr.bf16.mxu0 %v1483_v22  ;;  %1327 = vmatprep.subr.bf16.mxu1 %v1484_v23 }
 0x130   : > { %1306 = vmatpush3.bf16.msra.mxu0 %v1485_v24  ;;  %1328 = vmatpush3.bf16.msra.mxu1 %v1486_v25 }
 0x131   : > { %1307 = vmatprep.subr.bf16.mxu0 %v1487_v26  ;;  %1329 = vmatprep.subr.bf16.mxu1 %v1488_v27 }
 0x134   : > { %1308 = vmatpush3.bf16.msra.mxu0 %v1489_v28  ;;  %1330 = vmatpush3.bf16.msra.mxu1 %v1490_v29 }
 0x135   : > { %1309 = vmatprep.subr.bf16.mxu0 %v1491_v30  ;;  %1331 = vmatprep.subr.bf16.mxu1 %v1492_v31 }
 0x138   : > { %1310 = vmatpush3.bf16.msra.mxu0 %v1493_v32  ;;  %1332 = vmatpush3.bf16.msra.mxu1 %v1494_v33 }
 0x1ee   : > { %v627_v45 = vpop.f32.mrb[0].mxu0  ;;  %v670_v46 = vpop.f32.mrb[0].mxu1 }
 0x1ef   : > { %v1933_v47 = vadd.f32 %v627_v45, %v416_v41  ;;  %v1935_v48 = vadd.f32 %v670_v46, %v424_v42  ;;  %v629_v49 = vpop.f32.mrb[1].mxu0  ;;  %v672_v50 = vpop.f32.mrb[1].mxu1 }
 0x1f0   : > { %v1937_v51 = vadd.f32 %v629_v49, %v420_v43  ;;  %v1939_v52 = vadd.f32 %v672_v50, %v428_v44  ;;  %v631_v53 = vpop.f32.mrb[2].mxu0  ;;  %v674_v54 = vpop.f32.mrb[2].mxu1 }
 0x1f1   : > { %v679_v55 = vmul.f32 %v1933_v47, %v1933_v47  ;;  %v681_v56 = vmul.f32 %v1935_v48, %v1935_v48  ;;  %v1945_v57 = vadd.f32 %v631_v53, %v416_v41  ;;  %v1947_v58 = vadd.f32 %v674_v54, %v424_v42  ;;  %v633_v59 = vpop.f32.mrb[3].mxu0  ;;  %v676_v60 = vpop.f32.mrb[3].mxu1 }
 0x1f2   : > { %v680_v61 = vmul.f32 %v1937_v51, %v1937_v51  ;;  %v682_v62 = vmul.f32 %v1939_v52, %v1939_v52  ;;  %v1953_v63 = vadd.f32 %v633_v59, %v420_v43  ;;  %v1955_v2 = vadd.f32 %v676_v60, %v428_v44 }
 0x1f3   : > { %v687_v3 = vmul.f32 %v679_v55, %v1933_v47  ;;  %v689_v0 = vmul.f32 %v681_v56, %v1935_v48  ;;  %v683_v4 = vmul.f32 %v1945_v57, %v1945_v57  ;;  %v685_v5 = vmul.f32 %v1947_v58, %v1947_v58 }
 0x1f4   : > { %v688_v6 = vmul.f32 %v680_v61, %v1937_v51  ;;  %v690_v1 = vmul.f32 %v682_v62, %v1939_v52  ;;  %v684_v7 = vmul.f32 %v1953_v63, %v1953_v63  ;;  %v686_v8 = vmul.f32 %v1955_v2, %v1955_v2 }
 0x1f5   : > { %v695_v9 = vmul.f32 0.044715, %v687_v3  ;;  %v697_v10 = vmul.f32 0.044715, %v689_v0  ;;  %v691_v11 = vmul.f32 %v683_v4, %v1945_v57  ;;  %v693_v12 = vmul.f32 %v685_v5, %v1947_v58 }
 0x1f6   : > { %v696_v13 = vmul.f32 0.044715, %v688_v6  ;;  %v698_v14 = vmul.f32 0.044715, %v690_v1  ;;  %v692_v15 = vmul.f32 %v684_v7, %v1953_v63  ;;  %v694_v16 = vmul.f32 %v686_v8, %v1955_v2 }
 0x1f7   : > { %v703_v17 = vadd.f32 %v695_v9, %v1933_v47  ;;  %v705_v18 = vadd.f32 %v697_v10, %v1935_v48  ;;  %v699_v19 = vmul.f32 0.044715, %v691_v11  ;;  %v701_v20 = vmul.f32 0.044715, %v693_v12 }
 0x1f8   : > { %v704_v21 = vadd.f32 %v696_v13, %v1937_v51  ;;  %v706_v22 = vadd.f32 %v698_v14, %v1939_v52  ;;  %v700_v23 = vmul.f32 0.044715, %v692_v15  ;;  %v702_v24 = vmul.f32 0.044715, %v694_v16 }
 0x1f9   : > { %v711_v25 = vmul.f32 0.7978846, %v703_v17  ;;  %v713_v26 = vmul.f32 0.7978846, %v705_v18  ;;  %v707_v27 = vadd.f32 %v699_v19, %v1945_v57  ;;  %v709_v28 = vadd.f32 %v701_v20, %v1947_v58 }
 0x1fa   : > { %v712_v29 = vmul.f32 0.7978846, %v704_v21  ;;  %v714_v30 = vmul.f32 0.7978846, %v706_v22  ;;  %v708_v31 = vadd.f32 %v700_v23, %v1953_v63  ;;  %v710_v32 = vadd.f32 %v702_v24, %v1955_v2 }
 0x1fb   : > { %1499 = vtanh.f32 %v711_v25  ;;  %v715_v33 = vmul.f32 0.7978846, %v707_v27  ;;  %v717_v34 = vmul.f32 0.7978846, %v709_v28 }
 0x1fc   : > { %1501 = vtanh.f32 %v713_v26  ;;  %v716_v35 = vmul.f32 0.7978846, %v708_v31  ;;  %v718_v36 = vmul.f32 0.7978846, %v710_v32 }
 0x1fd   : > { %1503 = vtanh.f32 %v712_v29 }
 0x1fe   : > { %1505 = vtanh.f32 %v714_v30 }
 0x1ff   : > { %1507 = vtanh.f32 %v715_v33 }
 0x200   : > { %1509 = vtanh.f32 %v717_v34 }
 0x201   : > { %1511 = vtanh.f32 %v716_v35 }
 0x202   : > { %1513 = vtanh.f32 %v718_v36 }
 0x205   : > { %v1500_v37 = vpop.eup %1499 }
 0x206   : > { %v1502_v38 = vpop.eup %1501  ;;  %v727_v39 = vadd.f32 1.0, %v1500_v37 }
 0x207   : > { %v1504_v40 = vpop.eup %1503  ;;  %v729_v41 = vadd.f32 1.0, %v1502_v38 }
 0x208   : > { %v1506_v42 = vpop.eup %1505  ;;  %v728_v43 = vadd.f32 1.0, %v1504_v40  ;;  %v735_v49 = vmul.f32 0.5, %v727_v39 }
 0x209   : > { %v1508_v44 = vpop.eup %1507  ;;  %v730_v45 = vadd.f32 1.0, %v1506_v42  ;;  %v737_v54 = vmul.f32 0.5, %v729_v41 }
 0x20a   : > { %v1510_v46 = vpop.eup %1509  ;;  %v731_v50 = vadd.f32 1.0, %v1508_v44  ;;  %v736_v61 = vmul.f32 0.5, %v728_v43  ;;  %v743_v4 = vmul.f32 %v735_v49, %v1933_v47 }
 0x20b   : > { %v1512_v53 = vpop.eup %1511  ;;  %v733_v55 = vadd.f32 1.0, %v1510_v46  ;;  %v738_v0 = vmul.f32 0.5, %v730_v45  ;;  %v745_v1 = vmul.f32 %v737_v54, %v1935_v48 }
 0x20c   : > { %v1514_v56 = vpop.eup %1513  ;;  %v739_v59 = vmul.f32 0.5, %v731_v50  ;;  %v732_v60 = vadd.f32 1.0, %v1512_v53  ;;  %v744_v9 = vmul.f32 %v736_v61, %v1937_v51  ;;  %v1255_v51 = vld [vmem:[%s2050_s6] ss:$0 sm:$0xff] }
 0x20d   : > { %v741_v62 = vmul.f32 0.5, %v733_v55  ;;  %v734_v3 = vadd.f32 1.0, %v1514_v56  ;;  %v746_v12 = vmul.f32 %v738_v0, %v1939_v52 }
 0x20e   : > { %v747_v5 = vmul.f32 %v739_v59, %v1945_v57  ;;  %v740_v6 = vmul.f32 0.5, %v732_v60 }
 0x20f   : > { %v749_v7 = vmul.f32 %v741_v62, %v1947_v58  ;;  %v742_v8 = vmul.f32 0.5, %v734_v3 }
 0x210   : > { %v748_v10 = vmul.f32 %v740_v6, %v1953_v63  ;;  %v751_v11 = vpack.c.bf16 %v747_v5, %v743_v4 }
 0x211   : > { %v750_v13 = vmul.f32 %v742_v8, %v1955_v2  ;;  %v753_v14 = vpack.c.bf16 %v749_v7, %v745_v1 }
 0x212   : > { %v752_v47 = vpack.c.bf16 %v748_v10, %v744_v9 }
 0x213   : > { %v754_v15 = vpack.c.bf16 %v750_v13, %v746_v12 }
 0x214   : > { %1050 = vmatprep.mubr.bf16.mxu0 %v752_v47 }
 0x215   : > { %1091 = vmatprep.mubr.bf16.mxu1 %v754_v15  ;;  %1051 = vmatmul.mubr.bf16.vlgmr.msra.gmra.mrb[4].mxu0 %v751_v11 }
 0x216   : > { %1092 = vmatmul.mubr.bf16.vlgmr.msra.gmra.mrb[4].mxu1 %v753_v14 }
 0x2e8   : > { %v1311_v48 = vpop.f32.mrb[4].mxu0 }
 0x2e9   : > { %v1333_v57 = vpop.f32.mrb[4].mxu1  ;;  %v1312_v58 = vpop.f32.mrb[5].mxu0 }
 0x2ea   : > { %v1313_v63 = vadd.f32 %v1312_v58, %v1311_v48  ;;  %v1334_v52 = vpop.f32.mrb[5].mxu1  ;;  %v1314_v16 = vpop.f32.mrb[6].mxu0 }
 0x2eb   : > { %v1335_v2 = vadd.f32 %v1334_v52, %v1333_v57  ;;  %v1336_v17 = vpop.f32.mrb[6].mxu1  ;;  %v1315_v18 = vpop.f32.mrb[7].mxu0 }
 0x2ec   : > { %v1053_v19 = vadd.f32 %v1313_v63, %v1255_v51  ;;  %v1316_v20 = vadd.f32 %v1315_v18, %v1314_v16  ;;  %v1337_v21 = vpop.f32.mrb[7].mxu1 }
 0x2ed   : > { %v1338_v22 = vadd.f32 %v1337_v21, %v1336_v17 }
 0x2ee   : > { %v1094_v23 = vadd.f32 %v1335_v2, %v1053_v19  ;;  %v1056_v24 = vadd.f32 %v1316_v20, %v1255_v51 }
 0x2f0   : > { %1100 = vst [vmem:[%s325_s15] sm:$0xff] %v1094_v23  ;;  %v1097_v25 = vadd.f32 %v1338_v22, %v1056_v24 }
 0x2f2   : > { %1101 = vst [vmem:[%s325_s15 + $0x8] sm:$0xff] %v1097_v25 }
 0x2f3   : > { %1614 = shalt.err (!%p1611_p2)
}
 0x2f4   : > { %s1615_s10 = scalar_lea.hbm %s2000_s21, 256  ;;  %s1619_s15 = scalar_lea.hbm %s2051_s7, 512 }
 0x2f5   : > { %p1616_p13 = scmp.ne.s32.totalorder %s2000_s21, %s1615_s10  ;;  %p1620_p4 = scmp.lt.u32.totalorder %s2000_s21, %s2051_s7 }
 0x2f6   : > { %p1621_p7 = scmp.lt.u32.totalorder %s1619_s15, %s1615_s10  ;;  %p1623_p11 = scmp.lt.u32.totalorder %s1615_s10, %s2000_s21 }
 0x2f7   : > { %p1617_p6 = pnand %p1616_p13, %p2065_p0 }
 0x2f8   : > { %p1622_p8 = por %p1621_p7, %p1620_p4 }
 0x2f9   : > { %p1618_p10 = pneg %p1617_p6 }
 0x2fa   : > { %p1624_p1 = por %p1623_p11, %p1622_p8 }
 0x2fc   : > { %p1625_p3 = pnand %p1624_p1, %p1618_p10 }
 0x2fe   : > { %1628 = shalt.err (!%p1625_p3)
}
 0x2ff   : > { %s1684_s30 = smov 128   ;;  %s1685_s11 = smov 8  }
 0x300   : > { %1349 = dma.vmem_to_hbm [thread:$0]  (%p2065_p0), %s1995_s14, 256, %s2000_s21, %s1103_s9, %s1684_s30, %s1684_s30, %s1685_s11  }
 0x301 PF: > { %s1131_s28 = sand.u32 1, %s1659_s24   ;;  %p2066_p5 = scmp.ne.s32.totalorder %s2056_s8, 0 }
 0x302   : > { %p2067_p9 = scmp.ge.s32.totalorder %s1671_s27, 2  ;;  %s1132_s23 = scalar_lea.sflag [#allocation4], %s1131_s28 }
 0x304   : > { %p1363_p12 = pnand %p2067_p9, %p2066_p5 }
 0x306   : > { %1654 = dma.done.wait (!%p1363_p12), %s1132_s23, 256  }
 0x307   : > { %1656 = vsyncadd (!%p1363_p12), %s1132_s23, 4294967040  ;;  %p21_p2 = scmp.ge.s32.totalorder %s1836_s13, 4   ;;  %s2068_s24 = smov %s1663_s25 }
 0x308   : > { %s2069_s25 = smov %s1667_s26  ;;  %s2070_s26 = smov %s1845_s17 }
 0x309   : > { %s2071_s27 = smov %s1836_s13  ;;  %23 = sbr.rel (!%p21_p2) target bundleno = 6 (0x6), region = 101 }
 0x310   :  { %1137 = vsyncpa [#allocation3], 1 }
 0x311   :  { %1139 = vsyncpa [#allocation3 + $0x1], 1 }
 0x312   :  { %1140 = vsyncpa [#allocation6], 1 }
 0x313   :  { %1141 = vsyncpa [#allocation4], 1 }
 0x314   :  { %1143 = vsyncpa [#allocation4 + $0x1], 1 }

</bundles_post_ra>
